<compile_context>
chip_gen: v5e
topology: v5e:2x2
jax: 0.10.0
libtpu: 0.0.40
codegen_flags: <defaults>
</compile_context>

<pallas_src>
import math
import functools

import jax
import jax.numpy as jnp
import numpy as np
from jax import lax
from jax.experimental import pallas as pl
from jax.experimental.pallas import tpu as pltpu


_LN_EPS = 1e-5
_GELU_C = math.sqrt(2.0 / math.pi)


def _layernorm(x, g, b):
    # x: (T, C) f32; g/b: (1, C) f32
    mu = jnp.mean(x, axis=-1, keepdims=True)
    xc = x - mu
    var = jnp.mean(xc * xc, axis=-1, keepdims=True)
    inv = lax.rsqrt(var + _LN_EPS)                 # EUP rsqrt
    return xc * inv * g + b


def _gelu_tanh(x):
    # TODO(synk): PyTorch nn.GELU() default is the exact erf formulation; the
    # tanh approximation is used (max abs err ~3e-3 pre-projection) so the
    # nonlinearity lowers to the EUP tanh unit on all TPU generations.
    return 0.5 * x * (1.0 + jnp.tanh(_GELU_C * (x + 0.044715 * x * x * x)))


def _block_kernel(x_ref,
                  ln1_g_ref, ln1_b_ref,
                  w_q_ref, w_k_ref, w_v_ref,
                  b_q_ref, b_k_ref, b_v_ref,
                  w_o_ref, b_o_ref,
                  ln2_g_ref, ln2_b_ref,
                  w_fc1_ref, b_fc1_ref, w_fc2_ref, b_fc2_ref,
                  o_ref,
                  *, n_head, seq_len, batch_block):
    T = seq_len
    f32 = jnp.float32
    bf16 = jnp.bfloat16

    # Additive causal mask, built once per kernel invocation (compare+select
    # happens once; in the head loop it is a single VPU add).
    row = lax.broadcasted_iota(jnp.int32, (T, T), 0)
    col = lax.broadcasted_iota(jnp.int32, (T, T), 1)
    causal_bias = jnp.where(col <= row, 0.0, -1e30).astype(f32)

    # Hoist the (1, C)/(1, 4C) parameter rows (broadcast_in_dim is not CSE'd).
    ln1_g, ln1_b = ln1_g_ref[...], ln1_b_ref[...]
    ln2_g, ln2_b = ln2_g_ref[...], ln2_b_ref[...]
    b_o = b_o_ref[...]
    b_fc1 = b_fc1_ref[...]
    b_fc2 = b_fc2_ref[...]
    w_fc1 = w_fc1_ref[...]
    w_fc2 = w_fc2_ref[...]

    for b in range(batch_block):        # static unroll over batch rows in block
        x = x_ref[b].astype(f32)        # (T, C) residual stream kept in f32

        # ------------------- x + attn(ln1(x)) -----------------------------
        h = _layernorm(x, ln1_g, ln1_b)
        hb = h.astype(bf16)             # bf16 operands into the MXU

        attn_acc = jnp.zeros_like(x)    # (T, C) f32 accumulator (no concat)
        for hd in range(n_head):        # static unroll; no lane-dim slicing
            # Per-head projections: weights were pre-split on a LEADING axis in
            # the wrapper, so indexing is a cheap static slice.  The 1/sqrt(D)
            # attention scale is already folded into w_q / b_q.
            q = jnp.dot(hb, w_q_ref[hd], preferred_element_type=f32) + b_q_ref[hd]
            k = jnp.dot(hb, w_k_ref[hd], preferred_element_type=f32) + b_k_ref[hd]
            v = jnp.dot(hb, w_v_ref[hd], preferred_element_type=f32) + b_v_ref[hd]

            # Q @ K^T without materializing k.T (contract the D axes directly).
            att = lax.dot_general(
                q.astype(bf16), k.astype(bf16),
                dimension_numbers=(((1,), (1,)), ((), ())),
                preferred_element_type=f32)
            att = att + causal_bias                              # (T, T) f32

            # f32 softmax; approx reciprocal runs on the otherwise-idle EUP.
            att_max = jnp.max(att, axis=-1, keepdims=True)
            att_exp = jnp.exp(att - att_max)
            att_sum = jnp.sum(att_exp, axis=-1, keepdims=True)
            p = att_exp * pl.reciprocal(att_sum, approx=True)

            y = jnp.dot(p.astype(bf16), v.astype(bf16),
                        preferred_element_type=f32)              # (T, D)
            # Output projection folded into the head loop (w_o_ref[hd]: (D, C)).
            attn_acc = attn_acc + jnp.dot(y.astype(bf16), w_o_ref[hd],
                                          preferred_element_type=f32)

        x1 = x + attn_acc + b_o

        # ------------------- x + mlp(ln2(x)) ------------------------------
        h2 = _layernorm(x1, ln2_g, ln2_b).astype(bf16)
        ff = jnp.dot(h2, w_fc1, preferred_element_type=f32) + b_fc1   # (T, 4C)
        ff = _gelu_tanh(ff)
        ff = jnp.dot(ff.astype(bf16), w_fc2, preferred_element_type=f32) + b_fc2

        o_ref[b] = (x1 + ff).astype(o_ref.dtype)


def _const_spec(a):
    zeros = (0,) * a.ndim
    return pl.BlockSpec(a.shape, lambda i, _z=zeros: _z)


def transformer_block(x, params, *, n_head):
    """x: (B, T, C) f32.  Linear weights are stored transposed: (in, out)."""
    B, T, C = x.shape
    assert C % n_head == 0
    D = C // n_head
    f32, bf16 = jnp.float32, jnp.bfloat16

    # --- one-time layout plumbing (outside the kernel) ----------------------
    w_attn = params["w_attn"].astype(f32)          # (C, 3C)
    b_attn = params["b_attn"].astype(f32)          # (3C,)
    scale = 1.0 / math.sqrt(D)

    def split_heads_w(w):                          # (C, C) -> (H, C, D)
        return jnp.transpose(w.reshape(C, n_head, D), (1, 0, 2))

    def split_heads_b(b):                          # (C,) -> (H, 1, D)
        return b.reshape(n_head, 1, D)

    wq, wk, wv = jnp.split(w_attn, 3, axis=1)
    bq, bk, bv = jnp.split(b_attn, 3, axis=0)
    w_q = (split_heads_w(wq) * scale).astype(bf16)     # scale folded into Q
    w_k = split_heads_w(wk).astype(bf16)
    w_v = split_heads_w(wv).astype(bf16)
    b_q = (split_heads_b(bq) * scale).astype(f32)
    b_k = split_heads_b(bk).astype(f32)
    b_v = split_heads_b(bv).astype(f32)

    w_o = params["w_proj"].astype(f32).reshape(n_head, D, C).astype(bf16)
    b_o = params["b_proj"].astype(f32).reshape(1, C)

    ln1_g = params["ln1_g"].astype(f32).reshape(1, C)
    ln1_b = params["ln1_b"].astype(f32).reshape(1, C)
    ln2_g = params["ln2_g"].astype(f32).reshape(1, C)
    ln2_b = params["ln2_b"].astype(f32).reshape(1, C)

    w_fc1 = params["w_fc1"].astype(bf16)               # (C, 4C)
    b_fc1 = params["b_fc1"].astype(f32).reshape(1, 4 * C)
    w_fc2 = params["w_fc2"].astype(bf16)               # (4C, C)
    b_fc2 = params["b_fc2"].astype(f32).reshape(1, C)

    # --- grid: v7x has 2 TensorCores/chip -> keep a parallel batch axis.
    #     v5e/v6e are single-TC -> collapse to one grid step (each extra step
    #     costs ~0.35us, far more than this block's compute at these sizes).
    kind = jax.devices()[0].device_kind.lower()
    multi_tc = ("v7" in kind) or ("7x" in kind)
    batch_block = 1 if (multi_tc and B > 1) else B
    grid = (B // batch_block,)

    weight_args = (ln1_g, ln1_b, w_q, w_k, w_v, b_q, b_k, b_v, w_o, b_o,
                   ln2_g, ln2_b, w_fc1, b_fc1, w_fc2, b_fc2)

    kernel = functools.partial(
        _block_kernel, n_head=n_head, seq_len=T, batch_block=batch_block)

    # Advisory cost estimate (matmul flops + exp/tanh/rsqrt transcendentals).
    flops = int(B * (2 * T * C * (3 * C)        # qkv
                     + 2 * 2 * T * T * C        # qk^T + p@v (all heads)
                     + 2 * T * C * C            # out proj
                     + 2 * 2 * T * C * (4 * C)))  # fc1 + fc2
    transcendentals = int(B * (n_head * T * T + T * 4 * C + 4 * T))
    bytes_accessed = int(2 * x.size * x.dtype.itemsize
                         + sum(int(a.size) * a.dtype.itemsize
                               for a in weight_args))

    return pl.pallas_call(
        kernel,
        out_shape=jax.ShapeDtypeStruct((B, T, C), x.dtype),
        grid_spec=pltpu.PrefetchScalarGridSpec(
            num_scalar_prefetch=0,
            grid=grid,
            in_specs=[pl.BlockSpec((batch_block, T, C), lambda i: (i, 0, 0))]
                     + [_const_spec(a) for a in weight_args],
            out_specs=pl.BlockSpec((batch_block, T, C), lambda i: (i, 0, 0)),
        ),
        compiler_params=pltpu.CompilerParams(
            dimension_semantics=("parallel",)),
        cost_estimate=pl.CostEstimate(
            flops=flops, transcendentals=transcendentals,
            bytes_accessed=bytes_accessed),
    )(x, *weight_args)


def reference_block(x, params, *, n_head):
    """Pure-JAX f32 reference mirroring the PyTorch Block forward (dropout=0)."""
    B, T, C = x.shape
    D = C // n_head

    def layernorm(v, g, b):
        mu = v.mean(-1, keepdims=True)
        var = ((v - mu) ** 2).mean(-1, keepdims=True)
        return (v - mu) / jnp.sqrt(var + _LN_EPS) * g + b

    h = layernorm(x, params["ln1_g"], params["ln1_b"])
    qkv = h @ params["w_attn"] + params["b_attn"]
    q, k, v = jnp.split(qkv, 3, axis=-1)

    def heads(t):
        return t.reshape(B, T, n_head, D).transpose(0, 2, 1, 3)

    q, k, v = heads(q), heads(k), heads(v)
    att = jnp.einsum("bhtd,bhsd->bhts", q, k) / math.sqrt(D)
    mask = jnp.tril(jnp.ones((T, T), dtype=bool))
    att = jnp.where(mask[None, None], att, -jnp.inf)
    att = jax.nn.softmax(att, axis=-1)
    y = jnp.einsum("bhts,bhsd->bhtd", att, v)
    y = y.transpose(0, 2, 1, 3).reshape(B, T, C)
    x = x + y @ params["w_proj"] + params["b_proj"]

    h2 = layernorm(x, params["ln2_g"], params["ln2_b"])
    ff = h2 @ params["w_fc1"] + params["b_fc1"]
    ff = _gelu_tanh(ff)
    ff = ff @ params["w_fc2"] + params["b_fc2"]
    return x + ff


if __name__ == "__main__":
    # Block config: n_embd=32, n_head=4, block_size=8, bias=True, dropout=0.0
    B, T, C, n_head = 2, 8, 32, 4

    key = jax.random.PRNGKey(0)
    keys = jax.random.split(key, 13)

    def normal(k, shape, s):
        return s * jax.random.normal(k, shape, dtype=jnp.float32)

    x = normal(keys[0], (B, T, C), 1.0)
    params = dict(
        ln1_g=1.0 + normal(keys[1], (C,), 0.1),
        ln1_b=normal(keys[2], (C,), 0.1),
        w_attn=normal(keys[3], (C, 3 * C), 0.02),
        b_attn=normal(keys[4], (3 * C,), 0.01),
        w_proj=normal(keys[5], (C, C), 0.02),
        b_proj=normal(keys[6], (C,), 0.01),
        ln2_g=1.0 + normal(keys[7], (C,), 0.1),
        ln2_b=normal(keys[8], (C,), 0.1),
        w_fc1=normal(keys[9], (C, 4 * C), 0.02),
        b_fc1=normal(keys[10], (4 * C,), 0.01),
        w_fc2=normal(keys[11], (4 * C, C), 0.02),
        b_fc2=normal(keys[12], (C,), 0.01),
    )

    out = transformer_block(x, params, n_head=n_head)
    out = jax.block_until_ready(out)

    ref = reference_block(x, params, n_head=n_head)
    # bf16 MXU operands + approx reciprocal vs. the all-f32 reference.
    np.testing.assert_allclose(np.asarray(out), np.asarray(ref),
                               rtol=2e-2, atol=2e-2)

    print("KERNEL_OK")
</pallas_src>

<mosaic_0001>
module attributes {stable_mosaic.version = 11 : i64} {
  func.func @_block_kernel(%arg0: i32, %arg1: memref<2x8x32xf32, #tpu.memory_space<vmem>>, %arg2: memref<1x32xf32, #tpu.memory_space<vmem>>, %arg3: memref<1x32xf32, #tpu.memory_space<vmem>>, %arg4: memref<4x32x8xbf16, #tpu.memory_space<vmem>>, %arg5: memref<4x32x8xbf16, #tpu.memory_space<vmem>>, %arg6: memref<4x32x8xbf16, #tpu.memory_space<vmem>>, %arg7: memref<4x1x8xf32, #tpu.memory_space<vmem>>, %arg8: memref<4x1x8xf32, #tpu.memory_space<vmem>>, %arg9: memref<4x1x8xf32, #tpu.memory_space<vmem>>, %arg10: memref<4x8x32xbf16, #tpu.memory_space<vmem>>, %arg11: memref<1x32xf32, #tpu.memory_space<vmem>>, %arg12: memref<1x32xf32, #tpu.memory_space<vmem>>, %arg13: memref<1x32xf32, #tpu.memory_space<vmem>>, %arg14: memref<32x128xbf16, #tpu.memory_space<vmem>>, %arg15: memref<1x128xf32, #tpu.memory_space<vmem>>, %arg16: memref<128x32xbf16, #tpu.memory_space<vmem>>, %arg17: memref<1x32xf32, #tpu.memory_space<vmem>>, %arg18: memref<2x8x32xf32, #tpu.memory_space<vmem>>) attributes {dimension_semantics = [#tpu.dimension_semantics<parallel>], iteration_bounds = array<i64: 1>, scalar_prefetch = 0 : i64, scratch_operands = 0 : i64, tpu.core_type = #tpu.core_type<tc>, window_params = [{transform_indices = @transform_0, window_bounds = array<i64: 2, 8, 32>}, {pipeline_mode = #tpu.pipeline_mode<synchronous>, transform_indices = @transform_1, window_bounds = array<i64: 1, 32>}, {pipeline_mode = #tpu.pipeline_mode<synchronous>, transform_indices = @transform_2, window_bounds = array<i64: 1, 32>}, {pipeline_mode = #tpu.pipeline_mode<synchronous>, transform_indices = @transform_3, window_bounds = array<i64: 4, 32, 8>}, {pipeline_mode = #tpu.pipeline_mode<synchronous>, transform_indices = @transform_4, window_bounds = array<i64: 4, 32, 8>}, {pipeline_mode = #tpu.pipeline_mode<synchronous>, transform_indices = @transform_5, window_bounds = array<i64: 4, 32, 8>}, {pipeline_mode = #tpu.pipeline_mode<synchronous>, transform_indices = @transform_6, window_bounds = array<i64: 4, 1, 8>}, {pipeline_mode = #tpu.pipeline_mode<synchronous>, transform_indices = @transform_7, window_bounds = array<i64: 4, 1, 8>}, {pipeline_mode = #tpu.pipeline_mode<synchronous>, transform_indices = @transform_8, window_bounds = array<i64: 4, 1, 8>}, {pipeline_mode = #tpu.pipeline_mode<synchronous>, transform_indices = @transform_9, window_bounds = array<i64: 4, 8, 32>}, {pipeline_mode = #tpu.pipeline_mode<synchronous>, transform_indices = @transform_10, window_bounds = array<i64: 1, 32>}, {pipeline_mode = #tpu.pipeline_mode<synchronous>, transform_indices = @transform_11, window_bounds = array<i64: 1, 32>}, {pipeline_mode = #tpu.pipeline_mode<synchronous>, transform_indices = @transform_12, window_bounds = array<i64: 1, 32>}, {pipeline_mode = #tpu.pipeline_mode<synchronous>, transform_indices = @transform_13, window_bounds = array<i64: 32, 128>}, {pipeline_mode = #tpu.pipeline_mode<synchronous>, transform_indices = @transform_14, window_bounds = array<i64: 1, 128>}, {pipeline_mode = #tpu.pipeline_mode<synchronous>, transform_indices = @transform_15, window_bounds = array<i64: 128, 32>}, {pipeline_mode = #tpu.pipeline_mode<synchronous>, transform_indices = @transform_16, window_bounds = array<i64: 1, 32>}, {transform_indices = @transform_17, window_bounds = array<i64: 2, 8, 32>}]} {
    %0 = tpu.iota {dimensions = array<i32: 0>} : vector<8x8xi32>
    %1 = tpu.iota {dimensions = array<i32: 1>} : vector<8x8xi32>
    %2 = arith.cmpi sle, %1, %0 : vector<8x8xi32>
    %cst = arith.constant 0.000000e+00 : f32
    %cst_0 = arith.constant -1.000000e+30 : f32
    %3 = vector.broadcast %cst : f32 to vector<8x8xf32>
    %4 = vector.broadcast %cst_0 : f32 to vector<8x8xf32>
    %5 = arith.select %2, %3, %4 : vector<8x8xi1>, vector<8x8xf32>
    %c0 = arith.constant 0 : index
    %c0_1 = arith.constant 0 : index
    %6 = vector.load %arg2[%c0, %c0_1] : memref<1x32xf32, #tpu.memory_space<vmem>>, vector<1x32xf32>
    %c0_2 = arith.constant 0 : index
    %c0_3 = arith.constant 0 : index
    %7 = vector.load %arg3[%c0_2, %c0_3] : memref<1x32xf32, #tpu.memory_space<vmem>>, vector<1x32xf32>
    %c0_4 = arith.constant 0 : index
    %c0_5 = arith.constant 0 : index
    %8 = vector.load %arg12[%c0_4, %c0_5] : memref<1x32xf32, #tpu.memory_space<vmem>>, vector<1x32xf32>
    %c0_6 = arith.constant 0 : index
    %c0_7 = arith.constant 0 : index
    %9 = vector.load %arg13[%c0_6, %c0_7] : memref<1x32xf32, #tpu.memory_space<vmem>>, vector<1x32xf32>
    %c0_8 = arith.constant 0 : index
    %c0_9 = arith.constant 0 : index
    %10 = vector.load %arg11[%c0_8, %c0_9] : memref<1x32xf32, #tpu.memory_space<vmem>>, vector<1x32xf32>
    %c0_10 = arith.constant 0 : index
    %c0_11 = arith.constant 0 : index
    %11 = vector.load %arg15[%c0_10, %c0_11] : memref<1x128xf32, #tpu.memory_space<vmem>>, vector<1x128xf32>
    %c0_12 = arith.constant 0 : index
    %c0_13 = arith.constant 0 : index
    %12 = vector.load %arg17[%c0_12, %c0_13] : memref<1x32xf32, #tpu.memory_space<vmem>>, vector<1x32xf32>
    %c0_14 = arith.constant 0 : index
    %c0_15 = arith.constant 0 : index
    %13 = vector.load %arg14[%c0_14, %c0_15] : memref<32x128xbf16, #tpu.memory_space<vmem>>, vector<32x128xbf16>
    %c0_16 = arith.constant 0 : index
    %c0_17 = arith.constant 0 : index
    %14 = vector.load %arg16[%c0_16, %c0_17] : memref<128x32xbf16, #tpu.memory_space<vmem>>, vector<128x32xbf16>
    %c0_18 = arith.constant 0 : index
    %c0_19 = arith.constant 0 : index
    %c0_20 = arith.constant 0 : index
    %15 = vector.load %arg1[%c0_18, %c0_19, %c0_20] : memref<2x8x32xf32, #tpu.memory_space<vmem>>, vector<1x8x32xf32>
    %16 = vector.shape_cast %15 : vector<1x8x32xf32> to vector<8x32xf32>
    %cst_21 = arith.constant dense<0.000000e+00> : vector<8xf32>
    %17 = vector.multi_reduction <add>, %16, %cst_21 [1] : vector<8x32xf32> to vector<8xf32>
    %18 = vector.shape_cast %17 : vector<8xf32> to vector<8x1xf32>
    %cst_22 = arith.constant 3.200000e+01 : f32
    %19 = vector.broadcast %cst_22 : f32 to vector<8x1xf32>
    %20 = arith.divf %18, %19 : vector<8x1xf32>
    %21 = vector.broadcast %20 : vector<8x1xf32> to vector<8x32xf32>
    %22 = arith.subf %16, %21 : vector<8x32xf32>
    %23 = arith.mulf %22, %22 : vector<8x32xf32>
    %cst_23 = arith.constant dense<0.000000e+00> : vector<8xf32>
    %24 = vector.multi_reduction <add>, %23, %cst_23 [1] : vector<8x32xf32> to vector<8xf32>
    %25 = vector.shape_cast %24 : vector<8xf32> to vector<8x1xf32>
    %cst_24 = arith.constant 3.200000e+01 : f32
    %26 = vector.broadcast %cst_24 : f32 to vector<8x1xf32>
    %27 = arith.divf %25, %26 : vector<8x1xf32>
    %cst_25 = arith.constant 9.99999974E-6 : f32
    %28 = vector.broadcast %cst_25 : f32 to vector<8x1xf32>
    %29 = arith.addf %27, %28 : vector<8x1xf32>
    %30 = math.rsqrt %29 : vector<8x1xf32>
    %31 = vector.broadcast %30 : vector<8x1xf32> to vector<8x32xf32>
    %32 = arith.mulf %22, %31 : vector<8x32xf32>
    %33 = vector.broadcast %6 : vector<1x32xf32> to vector<8x32xf32>
    %34 = arith.mulf %32, %33 : vector<8x32xf32>
    %35 = vector.broadcast %7 : vector<1x32xf32> to vector<8x32xf32>
    %36 = arith.addf %34, %35 : vector<8x32xf32>
    %37 = arith.truncf %36 : vector<8x32xf32> to vector<8x32xbf16>
    %cst_26 = arith.constant 0.000000e+00 : f32
    %38 = vector.broadcast %cst_26 : f32 to vector<8x32xf32>
    %c0_27 = arith.constant 0 : index
    %c0_28 = arith.constant 0 : index
    %c0_29 = arith.constant 0 : index
    %39 = vector.load %arg4[%c0_27, %c0_28, %c0_29] : memref<4x32x8xbf16, #tpu.memory_space<vmem>>, vector<1x32x8xbf16>
    %40 = vector.shape_cast %39 : vector<1x32x8xbf16> to vector<32x8xbf16>
    %cst_30 = arith.constant dense<0.000000e+00> : vector<8x8xf32>
    %41 = tpu.matmul %37, %40, %cst_30 {dimension_numbers = #tpu.dot_dimension_numbers<[1], [0], [0], [1], [0, 0, 1, 1], [], []>} : vector<8x32xbf16>, vector<32x8xbf16>, vector<8x8xf32> -> vector<8x8xf32>
    %c0_31 = arith.constant 0 : index
    %c0_32 = arith.constant 0 : index
    %c0_33 = arith.constant 0 : index
    %42 = vector.load %arg7[%c0_31, %c0_32, %c0_33] : memref<4x1x8xf32, #tpu.memory_space<vmem>>, vector<1x1x8xf32>
    %43 = vector.shape_cast %42 : vector<1x1x8xf32> to vector<1x8xf32>
    %44 = vector.broadcast %43 : vector<1x8xf32> to vector<8x8xf32>
    %45 = arith.addf %41, %44 : vector<8x8xf32>
    %c0_34 = arith.constant 0 : index
    %c0_35 = arith.constant 0 : index
    %c0_36 = arith.constant 0 : index
    %46 = vector.load %arg5[%c0_34, %c0_35, %c0_36] : memref<4x32x8xbf16, #tpu.memory_space<vmem>>, vector<1x32x8xbf16>
    %47 = vector.shape_cast %46 : vector<1x32x8xbf16> to vector<32x8xbf16>
    %cst_37 = arith.constant dense<0.000000e+00> : vector<8x8xf32>
    %48 = tpu.matmul %37, %47, %cst_37 {dimension_numbers = #tpu.dot_dimension_numbers<[1], [0], [0], [1], [0, 0, 1, 1], [], []>} : vector<8x32xbf16>, vector<32x8xbf16>, vector<8x8xf32> -> vector<8x8xf32>
    %c0_38 = arith.constant 0 : index
    %c0_39 = arith.constant 0 : index
    %c0_40 = arith.constant 0 : index
    %49 = vector.load %arg8[%c0_38, %c0_39, %c0_40] : memref<4x1x8xf32, #tpu.memory_space<vmem>>, vector<1x1x8xf32>
    %50 = vector.shape_cast %49 : vector<1x1x8xf32> to vector<1x8xf32>
    %51 = vector.broadcast %50 : vector<1x8xf32> to vector<8x8xf32>
    %52 = arith.addf %48, %51 : vector<8x8xf32>
    %c0_41 = arith.constant 0 : index
    %c0_42 = arith.constant 0 : index
    %c0_43 = arith.constant 0 : index
    %53 = vector.load %arg6[%c0_41, %c0_42, %c0_43] : memref<4x32x8xbf16, #tpu.memory_space<vmem>>, vector<1x32x8xbf16>
    %54 = vector.shape_cast %53 : vector<1x32x8xbf16> to vector<32x8xbf16>
    %cst_44 = arith.constant dense<0.000000e+00> : vector<8x8xf32>
    %55 = tpu.matmul %37, %54, %cst_44 {dimension_numbers = #tpu.dot_dimension_numbers<[1], [0], [0], [1], [0, 0, 1, 1], [], []>} : vector<8x32xbf16>, vector<32x8xbf16>, vector<8x8xf32> -> vector<8x8xf32>
    %c0_45 = arith.constant 0 : index
    %c0_46 = arith.constant 0 : index
    %c0_47 = arith.constant 0 : index
    %56 = vector.load %arg9[%c0_45, %c0_46, %c0_47] : memref<4x1x8xf32, #tpu.memory_space<vmem>>, vector<1x1x8xf32>
    %57 = vector.shape_cast %56 : vector<1x1x8xf32> to vector<1x8xf32>
    %58 = vector.broadcast %57 : vector<1x8xf32> to vector<8x8xf32>
    %59 = arith.addf %55, %58 : vector<8x8xf32>
    %60 = arith.truncf %45 : vector<8x8xf32> to vector<8x8xbf16>
    %61 = arith.truncf %52 : vector<8x8xf32> to vector<8x8xbf16>
    %cst_48 = arith.constant dense<0.000000e+00> : vector<8x8xf32>
    %62 = tpu.matmul %60, %61, %cst_48 {dimension_numbers = #tpu.dot_dimension_numbers<[1], [1], [0], [0], [0, 0, 1, 0], [], []>} : vector<8x8xbf16>, vector<8x8xbf16>, vector<8x8xf32> -> vector<8x8xf32>
    %63 = arith.addf %62, %5 : vector<8x8xf32>
    %cst_49 = arith.constant dense<0xFF800000> : vector<8xf32>
    %64 = vector.multi_reduction <maximumf>, %63, %cst_49 [1] : vector<8x8xf32> to vector<8xf32>
    %65 = vector.shape_cast %64 : vector<8xf32> to vector<8x1xf32>
    %66 = vector.broadcast %65 : vector<8x1xf32> to vector<8x8xf32>
    %67 = arith.subf %63, %66 : vector<8x8xf32>
    %68 = math.exp %67 : vector<8x8xf32>
    %cst_50 = arith.constant dense<0.000000e+00> : vector<8xf32>
    %69 = vector.multi_reduction <add>, %68, %cst_50 [1] : vector<8x8xf32> to vector<8xf32>
    %70 = vector.shape_cast %69 : vector<8xf32> to vector<8x1xf32>
    %71 = tpu.reciprocal %70 {approx = true} : vector<8x1xf32> -> vector<8x1xf32>
    %72 = vector.broadcast %71 : vector<8x1xf32> to vector<8x8xf32>
    %73 = arith.mulf %68, %72 : vector<8x8xf32>
    %74 = arith.truncf %73 : vector<8x8xf32> to vector<8x8xbf16>
    %75 = arith.truncf %59 : vector<8x8xf32> to vector<8x8xbf16>
    %cst_51 = arith.constant dense<0.000000e+00> : vector<8x8xf32>
    %76 = tpu.matmul %74, %75, %cst_51 {dimension_numbers = #tpu.dot_dimension_numbers<[1], [0], [0], [1], [0, 0, 1, 1], [], []>} : vector<8x8xbf16>, vector<8x8xbf16>, vector<8x8xf32> -> vector<8x8xf32>
    %77 = arith.truncf %76 : vector<8x8xf32> to vector<8x8xbf16>
    %c0_52 = arith.constant 0 : index
    %c0_53 = arith.constant 0 : index
    %c0_54 = arith.constant 0 : index
    %78 = vector.load %arg10[%c0_52, %c0_53, %c0_54] : memref<4x8x32xbf16, #tpu.memory_space<vmem>>, vector<1x8x32xbf16>
    %79 = vector.shape_cast %78 : vector<1x8x32xbf16> to vector<8x32xbf16>
    %cst_55 = arith.constant dense<0.000000e+00> : vector<8x32xf32>
    %80 = tpu.matmul %77, %79, %cst_55 {dimension_numbers = #tpu.dot_dimension_numbers<[1], [0], [0], [1], [0, 0, 1, 1], [], []>} : vector<8x8xbf16>, vector<8x32xbf16>, vector<8x32xf32> -> vector<8x32xf32>
    %81 = arith.addf %38, %80 : vector<8x32xf32>
    %c1 = arith.constant 1 : index
    %c0_56 = arith.constant 0 : index
    %c0_57 = arith.constant 0 : index
    %82 = vector.load %arg4[%c1, %c0_56, %c0_57] : memref<4x32x8xbf16, #tpu.memory_space<vmem>>, vector<1x32x8xbf16>
    %83 = vector.shape_cast %82 : vector<1x32x8xbf16> to vector<32x8xbf16>
    %cst_58 = arith.constant dense<0.000000e+00> : vector<8x8xf32>
    %84 = tpu.matmul %37, %83, %cst_58 {dimension_numbers = #tpu.dot_dimension_numbers<[1], [0], [0], [1], [0, 0, 1, 1], [], []>} : vector<8x32xbf16>, vector<32x8xbf16>, vector<8x8xf32> -> vector<8x8xf32>
    %c1_59 = arith.constant 1 : index
    %c0_60 = arith.constant 0 : index
    %c0_61 = arith.constant 0 : index
    %85 = vector.load %arg7[%c1_59, %c0_60, %c0_61] : memref<4x1x8xf32, #tpu.memory_space<vmem>>, vector<1x1x8xf32>
    %86 = vector.shape_cast %85 : vector<1x1x8xf32> to vector<1x8xf32>
    %87 = vector.broadcast %86 : vector<1x8xf32> to vector<8x8xf32>
    %88 = arith.addf %84, %87 : vector<8x8xf32>
    %c1_62 = arith.constant 1 : index
    %c0_63 = arith.constant 0 : index
    %c0_64 = arith.constant 0 : index
    %89 = vector.load %arg5[%c1_62, %c0_63, %c0_64] : memref<4x32x8xbf16, #tpu.memory_space<vmem>>, vector<1x32x8xbf16>
    %90 = vector.shape_cast %89 : vector<1x32x8xbf16> to vector<32x8xbf16>
    %cst_65 = arith.constant dense<0.000000e+00> : vector<8x8xf32>
    %91 = tpu.matmul %37, %90, %cst_65 {dimension_numbers = #tpu.dot_dimension_numbers<[1], [0], [0], [1], [0, 0, 1, 1], [], []>} : vector<8x32xbf16>, vector<32x8xbf16>, vector<8x8xf32> -> vector<8x8xf32>
    %c1_66 = arith.constant 1 : index
    %c0_67 = arith.constant 0 : index
    %c0_68 = arith.constant 0 : index
    %92 = vector.load %arg8[%c1_66, %c0_67, %c0_68] : memref<4x1x8xf32, #tpu.memory_space<vmem>>, vector<1x1x8xf32>
    %93 = vector.shape_cast %92 : vector<1x1x8xf32> to vector<1x8xf32>
    %94 = vector.broadcast %93 : vector<1x8xf32> to vector<8x8xf32>
    %95 = arith.addf %91, %94 : vector<8x8xf32>
    %c1_69 = arith.constant 1 : index
    %c0_70 = arith.constant 0 : index
    %c0_71 = arith.constant 0 : index
    %96 = vector.load %arg6[%c1_69, %c0_70, %c0_71] : memref<4x32x8xbf16, #tpu.memory_space<vmem>>, vector<1x32x8xbf16>
    %97 = vector.shape_cast %96 : vector<1x32x8xbf16> to vector<32x8xbf16>
    %cst_72 = arith.constant dense<0.000000e+00> : vector<8x8xf32>
    %98 = tpu.matmul %37, %97, %cst_72 {dimension_numbers = #tpu.dot_dimension_numbers<[1], [0], [0], [1], [0, 0, 1, 1], [], []>} : vector<8x32xbf16>, vector<32x8xbf16>, vector<8x8xf32> -> vector<8x8xf32>
    %c1_73 = arith.constant 1 : index
    %c0_74 = arith.constant 0 : index
    %c0_75 = arith.constant 0 : index
    %99 = vector.load %arg9[%c1_73, %c0_74, %c0_75] : memref<4x1x8xf32, #tpu.memory_space<vmem>>, vector<1x1x8xf32>
    %100 = vector.shape_cast %99 : vector<1x1x8xf32> to vector<1x8xf32>
    %101 = vector.broadcast %100 : vector<1x8xf32> to vector<8x8xf32>
    %102 = arith.addf %98, %101 : vector<8x8xf32>
    %103 = arith.truncf %88 : vector<8x8xf32> to vector<8x8xbf16>
    %104 = arith.truncf %95 : vector<8x8xf32> to vector<8x8xbf16>
    %cst_76 = arith.constant dense<0.000000e+00> : vector<8x8xf32>
    %105 = tpu.matmul %103, %104, %cst_76 {dimension_numbers = #tpu.dot_dimension_numbers<[1], [1], [0], [0], [0, 0, 1, 0], [], []>} : vector<8x8xbf16>, vector<8x8xbf16>, vector<8x8xf32> -> vector<8x8xf32>
    %106 = arith.addf %105, %5 : vector<8x8xf32>
    %cst_77 = arith.constant dense<0xFF800000> : vector<8xf32>
    %107 = vector.multi_reduction <maximumf>, %106, %cst_77 [1] : vector<8x8xf32> to vector<8xf32>
    %108 = vector.shape_cast %107 : vector<8xf32> to vector<8x1xf32>
    %109 = vector.broadcast %108 : vector<8x1xf32> to vector<8x8xf32>
    %110 = arith.subf %106, %109 : vector<8x8xf32>
    %111 = math.exp %110 : vector<8x8xf32>
    %cst_78 = arith.constant dense<0.000000e+00> : vector<8xf32>
    %112 = vector.multi_reduction <add>, %111, %cst_78 [1] : vector<8x8xf32> to vector<8xf32>
    %113 = vector.shape_cast %112 : vector<8xf32> to vector<8x1xf32>
    %114 = tpu.reciprocal %113 {approx = true} : vector<8x1xf32> -> vector<8x1xf32>
    %115 = vector.broadcast %114 : vector<8x1xf32> to vector<8x8xf32>
    %116 = arith.mulf %111, %115 : vector<8x8xf32>
    %117 = arith.truncf %116 : vector<8x8xf32> to vector<8x8xbf16>
    %118 = arith.truncf %102 : vector<8x8xf32> to vector<8x8xbf16>
    %cst_79 = arith.constant dense<0.000000e+00> : vector<8x8xf32>
    %119 = tpu.matmul %117, %118, %cst_79 {dimension_numbers = #tpu.dot_dimension_numbers<[1], [0], [0], [1], [0, 0, 1, 1], [], []>} : vector<8x8xbf16>, vector<8x8xbf16>, vector<8x8xf32> -> vector<8x8xf32>
    %120 = arith.truncf %119 : vector<8x8xf32> to vector<8x8xbf16>
    %c1_80 = arith.constant 1 : index
    %c0_81 = arith.constant 0 : index
    %c0_82 = arith.constant 0 : index
    %121 = vector.load %arg10[%c1_80, %c0_81, %c0_82] : memref<4x8x32xbf16, #tpu.memory_space<vmem>>, vector<1x8x32xbf16>
    %122 = vector.shape_cast %121 : vector<1x8x32xbf16> to vector<8x32xbf16>
    %cst_83 = arith.constant dense<0.000000e+00> : vector<8x32xf32>
    %123 = tpu.matmul %120, %122, %cst_83 {dimension_numbers = #tpu.dot_dimension_numbers<[1], [0], [0], [1], [0, 0, 1, 1], [], []>} : vector<8x8xbf16>, vector<8x32xbf16>, vector<8x32xf32> -> vector<8x32xf32>
    %124 = arith.addf %81, %123 : vector<8x32xf32>
    %c2 = arith.constant 2 : index
    %c0_84 = arith.constant 0 : index
    %c0_85 = arith.constant 0 : index
    %125 = vector.load %arg4[%c2, %c0_84, %c0_85] : memref<4x32x8xbf16, #tpu.memory_space<vmem>>, vector<1x32x8xbf16>
    %126 = vector.shape_cast %125 : vector<1x32x8xbf16> to vector<32x8xbf16>
    %cst_86 = arith.constant dense<0.000000e+00> : vector<8x8xf32>
    %127 = tpu.matmul %37, %126, %cst_86 {dimension_numbers = #tpu.dot_dimension_numbers<[1], [0], [0], [1], [0, 0, 1, 1], [], []>} : vector<8x32xbf16>, vector<32x8xbf16>, vector<8x8xf32> -> vector<8x8xf32>
    %c2_87 = arith.constant 2 : index
    %c0_88 = arith.constant 0 : index
    %c0_89 = arith.constant 0 : index
    %128 = vector.load %arg7[%c2_87, %c0_88, %c0_89] : memref<4x1x8xf32, #tpu.memory_space<vmem>>, vector<1x1x8xf32>
    %129 = vector.shape_cast %128 : vector<1x1x8xf32> to vector<1x8xf32>
    %130 = vector.broadcast %129 : vector<1x8xf32> to vector<8x8xf32>
    %131 = arith.addf %127, %130 : vector<8x8xf32>
    %c2_90 = arith.constant 2 : index
    %c0_91 = arith.constant 0 : index
    %c0_92 = arith.constant 0 : index
    %132 = vector.load %arg5[%c2_90, %c0_91, %c0_92] : memref<4x32x8xbf16, #tpu.memory_space<vmem>>, vector<1x32x8xbf16>
    %133 = vector.shape_cast %132 : vector<1x32x8xbf16> to vector<32x8xbf16>
    %cst_93 = arith.constant dense<0.000000e+00> : vector<8x8xf32>
    %134 = tpu.matmul %37, %133, %cst_93 {dimension_numbers = #tpu.dot_dimension_numbers<[1], [0], [0], [1], [0, 0, 1, 1], [], []>} : vector<8x32xbf16>, vector<32x8xbf16>, vector<8x8xf32> -> vector<8x8xf32>
    %c2_94 = arith.constant 2 : index
    %c0_95 = arith.constant 0 : index
    %c0_96 = arith.constant 0 : index
    %135 = vector.load %arg8[%c2_94, %c0_95, %c0_96] : memref<4x1x8xf32, #tpu.memory_space<vmem>>, vector<1x1x8xf32>
    %136 = vector.shape_cast %135 : vector<1x1x8xf32> to vector<1x8xf32>
    %137 = vector.broadcast %136 : vector<1x8xf32> to vector<8x8xf32>
    %138 = arith.addf %134, %137 : vector<8x8xf32>
    %c2_97 = arith.constant 2 : index
    %c0_98 = arith.constant 0 : index
    %c0_99 = arith.constant 0 : index
    %139 = vector.load %arg6[%c2_97, %c0_98, %c0_99] : memref<4x32x8xbf16, #tpu.memory_space<vmem>>, vector<1x32x8xbf16>
    %140 = vector.shape_cast %139 : vector<1x32x8xbf16> to vector<32x8xbf16>
    %cst_100 = arith.constant dense<0.000000e+00> : vector<8x8xf32>
    %141 = tpu.matmul %37, %140, %cst_100 {dimension_numbers = #tpu.dot_dimension_numbers<[1], [0], [0], [1], [0, 0, 1, 1], [], []>} : vector<8x32xbf16>, vector<32x8xbf16>, vector<8x8xf32> -> vector<8x8xf32>
    %c2_101 = arith.constant 2 : index
    %c0_102 = arith.constant 0 : index
    %c0_103 = arith.constant 0 : index
    %142 = vector.load %arg9[%c2_101, %c0_102, %c0_103] : memref<4x1x8xf32, #tpu.memory_space<vmem>>, vector<1x1x8xf32>
    %143 = vector.shape_cast %142 : vector<1x1x8xf32> to vector<1x8xf32>
    %144 = vector.broadcast %143 : vector<1x8xf32> to vector<8x8xf32>
    %145 = arith.addf %141, %144 : vector<8x8xf32>
    %146 = arith.truncf %131 : vector<8x8xf32> to vector<8x8xbf16>
    %147 = arith.truncf %138 : vector<8x8xf32> to vector<8x8xbf16>
    %cst_104 = arith.constant dense<0.000000e+00> : vector<8x8xf32>
    %148 = tpu.matmul %146, %147, %cst_104 {dimension_numbers = #tpu.dot_dimension_numbers<[1], [1], [0], [0], [0, 0, 1, 0], [], []>} : vector<8x8xbf16>, vector<8x8xbf16>, vector<8x8xf32> -> vector<8x8xf32>
    %149 = arith.addf %148, %5 : vector<8x8xf32>
    %cst_105 = arith.constant dense<0xFF800000> : vector<8xf32>
    %150 = vector.multi_reduction <maximumf>, %149, %cst_105 [1] : vector<8x8xf32> to vector<8xf32>
    %151 = vector.shape_cast %150 : vector<8xf32> to vector<8x1xf32>
    %152 = vector.broadcast %151 : vector<8x1xf32> to vector<8x8xf32>
    %153 = arith.subf %149, %152 : vector<8x8xf32>
    %154 = math.exp %153 : vector<8x8xf32>
    %cst_106 = arith.constant dense<0.000000e+00> : vector<8xf32>
    %155 = vector.multi_reduction <add>, %154, %cst_106 [1] : vector<8x8xf32> to vector<8xf32>
    %156 = vector.shape_cast %155 : vector<8xf32> to vector<8x1xf32>
    %157 = tpu.reciprocal %156 {approx = true} : vector<8x1xf32> -> vector<8x1xf32>
    %158 = vector.broadcast %157 : vector<8x1xf32> to vector<8x8xf32>
    %159 = arith.mulf %154, %158 : vector<8x8xf32>
    %160 = arith.truncf %159 : vector<8x8xf32> to vector<8x8xbf16>
    %161 = arith.truncf %145 : vector<8x8xf32> to vector<8x8xbf16>
    %cst_107 = arith.constant dense<0.000000e+00> : vector<8x8xf32>
    %162 = tpu.matmul %160, %161, %cst_107 {dimension_numbers = #tpu.dot_dimension_numbers<[1], [0], [0], [1], [0, 0, 1, 1], [], []>} : vector<8x8xbf16>, vector<8x8xbf16>, vector<8x8xf32> -> vector<8x8xf32>
    %163 = arith.truncf %162 : vector<8x8xf32> to vector<8x8xbf16>
    %c2_108 = arith.constant 2 : index
    %c0_109 = arith.constant 0 : index
    %c0_110 = arith.constant 0 : index
    %164 = vector.load %arg10[%c2_108, %c0_109, %c0_110] : memref<4x8x32xbf16, #tpu.memory_space<vmem>>, vector<1x8x32xbf16>
    %165 = vector.shape_cast %164 : vector<1x8x32xbf16> to vector<8x32xbf16>
    %cst_111 = arith.constant dense<0.000000e+00> : vector<8x32xf32>
    %166 = tpu.matmul %163, %165, %cst_111 {dimension_numbers = #tpu.dot_dimension_numbers<[1], [0], [0], [1], [0, 0, 1, 1], [], []>} : vector<8x8xbf16>, vector<8x32xbf16>, vector<8x32xf32> -> vector<8x32xf32>
    %167 = arith.addf %124, %166 : vector<8x32xf32>
    %c3 = arith.constant 3 : index
    %c0_112 = arith.constant 0 : index
    %c0_113 = arith.constant 0 : index
    %168 = vector.load %arg4[%c3, %c0_112, %c0_113] : memref<4x32x8xbf16, #tpu.memory_space<vmem>>, vector<1x32x8xbf16>
    %169 = vector.shape_cast %168 : vector<1x32x8xbf16> to vector<32x8xbf16>
    %cst_114 = arith.constant dense<0.000000e+00> : vector<8x8xf32>
    %170 = tpu.matmul %37, %169, %cst_114 {dimension_numbers = #tpu.dot_dimension_numbers<[1], [0], [0], [1], [0, 0, 1, 1], [], []>} : vector<8x32xbf16>, vector<32x8xbf16>, vector<8x8xf32> -> vector<8x8xf32>
    %c3_115 = arith.constant 3 : index
    %c0_116 = arith.constant 0 : index
    %c0_117 = arith.constant 0 : index
    %171 = vector.load %arg7[%c3_115, %c0_116, %c0_117] : memref<4x1x8xf32, #tpu.memory_space<vmem>>, vector<1x1x8xf32>
    %172 = vector.shape_cast %171 : vector<1x1x8xf32> to vector<1x8xf32>
    %173 = vector.broadcast %172 : vector<1x8xf32> to vector<8x8xf32>
    %174 = arith.addf %170, %173 : vector<8x8xf32>
    %c3_118 = arith.constant 3 : index
    %c0_119 = arith.constant 0 : index
    %c0_120 = arith.constant 0 : index
    %175 = vector.load %arg5[%c3_118, %c0_119, %c0_120] : memref<4x32x8xbf16, #tpu.memory_space<vmem>>, vector<1x32x8xbf16>
    %176 = vector.shape_cast %175 : vector<1x32x8xbf16> to vector<32x8xbf16>
    %cst_121 = arith.constant dense<0.000000e+00> : vector<8x8xf32>
    %177 = tpu.matmul %37, %176, %cst_121 {dimension_numbers = #tpu.dot_dimension_numbers<[1], [0], [0], [1], [0, 0, 1, 1], [], []>} : vector<8x32xbf16>, vector<32x8xbf16>, vector<8x8xf32> -> vector<8x8xf32>
    %c3_122 = arith.constant 3 : index
    %c0_123 = arith.constant 0 : index
    %c0_124 = arith.constant 0 : index
    %178 = vector.load %arg8[%c3_122, %c0_123, %c0_124] : memref<4x1x8xf32, #tpu.memory_space<vmem>>, vector<1x1x8xf32>
    %179 = vector.shape_cast %178 : vector<1x1x8xf32> to vector<1x8xf32>
    %180 = vector.broadcast %179 : vector<1x8xf32> to vector<8x8xf32>
    %181 = arith.addf %177, %180 : vector<8x8xf32>
    %c3_125 = arith.constant 3 : index
    %c0_126 = arith.constant 0 : index
    %c0_127 = arith.constant 0 : index
    %182 = vector.load %arg6[%c3_125, %c0_126, %c0_127] : memref<4x32x8xbf16, #tpu.memory_space<vmem>>, vector<1x32x8xbf16>
    %183 = vector.shape_cast %182 : vector<1x32x8xbf16> to vector<32x8xbf16>
    %cst_128 = arith.constant dense<0.000000e+00> : vector<8x8xf32>
    %184 = tpu.matmul %37, %183, %cst_128 {dimension_numbers = #tpu.dot_dimension_numbers<[1], [0], [0], [1], [0, 0, 1, 1], [], []>} : vector<8x32xbf16>, vector<32x8xbf16>, vector<8x8xf32> -> vector<8x8xf32>
    %c3_129 = arith.constant 3 : index
    %c0_130 = arith.constant 0 : index
    %c0_131 = arith.constant 0 : index
    %185 = vector.load %arg9[%c3_129, %c0_130, %c0_131] : memref<4x1x8xf32, #tpu.memory_space<vmem>>, vector<1x1x8xf32>
    %186 = vector.shape_cast %185 : vector<1x1x8xf32> to vector<1x8xf32>
    %187 = vector.broadcast %186 : vector<1x8xf32> to vector<8x8xf32>
    %188 = arith.addf %184, %187 : vector<8x8xf32>
    %189 = arith.truncf %174 : vector<8x8xf32> to vector<8x8xbf16>
    %190 = arith.truncf %181 : vector<8x8xf32> to vector<8x8xbf16>
    %cst_132 = arith.constant dense<0.000000e+00> : vector<8x8xf32>
    %191 = tpu.matmul %189, %190, %cst_132 {dimension_numbers = #tpu.dot_dimension_numbers<[1], [1], [0], [0], [0, 0, 1, 0], [], []>} : vector<8x8xbf16>, vector<8x8xbf16>, vector<8x8xf32> -> vector<8x8xf32>
    %192 = arith.addf %191, %5 : vector<8x8xf32>
    %cst_133 = arith.constant dense<0xFF800000> : vector<8xf32>
    %193 = vector.multi_reduction <maximumf>, %192, %cst_133 [1] : vector<8x8xf32> to vector<8xf32>
    %194 = vector.shape_cast %193 : vector<8xf32> to vector<8x1xf32>
    %195 = vector.broadcast %194 : vector<8x1xf32> to vector<8x8xf32>
    %196 = arith.subf %192, %195 : vector<8x8xf32>
    %197 = math.exp %196 : vector<8x8xf32>
    %cst_134 = arith.constant dense<0.000000e+00> : vector<8xf32>
    %198 = vector.multi_reduction <add>, %197, %cst_134 [1] : vector<8x8xf32> to vector<8xf32>
    %199 = vector.shape_cast %198 : vector<8xf32> to vector<8x1xf32>
    %200 = tpu.reciprocal %199 {approx = true} : vector<8x1xf32> -> vector<8x1xf32>
    %201 = vector.broadcast %200 : vector<8x1xf32> to vector<8x8xf32>
    %202 = arith.mulf %197, %201 : vector<8x8xf32>
    %203 = arith.truncf %202 : vector<8x8xf32> to vector<8x8xbf16>
    %204 = arith.truncf %188 : vector<8x8xf32> to vector<8x8xbf16>
    %cst_135 = arith.constant dense<0.000000e+00> : vector<8x8xf32>
    %205 = tpu.matmul %203, %204, %cst_135 {dimension_numbers = #tpu.dot_dimension_numbers<[1], [0], [0], [1], [0, 0, 1, 1], [], []>} : vector<8x8xbf16>, vector<8x8xbf16>, vector<8x8xf32> -> vector<8x8xf32>
    %206 = arith.truncf %205 : vector<8x8xf32> to vector<8x8xbf16>
    %c3_136 = arith.constant 3 : index
    %c0_137 = arith.constant 0 : index
    %c0_138 = arith.constant 0 : index
    %207 = vector.load %arg10[%c3_136, %c0_137, %c0_138] : memref<4x8x32xbf16, #tpu.memory_space<vmem>>, vector<1x8x32xbf16>
    %208 = vector.shape_cast %207 : vector<1x8x32xbf16> to vector<8x32xbf16>
    %cst_139 = arith.constant dense<0.000000e+00> : vector<8x32xf32>
    %209 = tpu.matmul %206, %208, %cst_139 {dimension_numbers = #tpu.dot_dimension_numbers<[1], [0], [0], [1], [0, 0, 1, 1], [], []>} : vector<8x8xbf16>, vector<8x32xbf16>, vector<8x32xf32> -> vector<8x32xf32>
    %210 = arith.addf %167, %209 : vector<8x32xf32>
    %211 = arith.addf %16, %210 : vector<8x32xf32>
    %212 = vector.broadcast %10 : vector<1x32xf32> to vector<8x32xf32>
    %213 = arith.addf %211, %212 : vector<8x32xf32>
    %cst_140 = arith.constant dense<0.000000e+00> : vector<8xf32>
    %214 = vector.multi_reduction <add>, %213, %cst_140 [1] : vector<8x32xf32> to vector<8xf32>
    %215 = vector.shape_cast %214 : vector<8xf32> to vector<8x1xf32>
    %cst_141 = arith.constant 3.200000e+01 : f32
    %216 = vector.broadcast %cst_141 : f32 to vector<8x1xf32>
    %217 = arith.divf %215, %216 : vector<8x1xf32>
    %218 = vector.broadcast %217 : vector<8x1xf32> to vector<8x32xf32>
    %219 = arith.subf %213, %218 : vector<8x32xf32>
    %220 = arith.mulf %219, %219 : vector<8x32xf32>
    %cst_142 = arith.constant dense<0.000000e+00> : vector<8xf32>
    %221 = vector.multi_reduction <add>, %220, %cst_142 [1] : vector<8x32xf32> to vector<8xf32>
    %222 = vector.shape_cast %221 : vector<8xf32> to vector<8x1xf32>
    %cst_143 = arith.constant 3.200000e+01 : f32
    %223 = vector.broadcast %cst_143 : f32 to vector<8x1xf32>
    %224 = arith.divf %222, %223 : vector<8x1xf32>
    %cst_144 = arith.constant 9.99999974E-6 : f32
    %225 = vector.broadcast %cst_144 : f32 to vector<8x1xf32>
    %226 = arith.addf %224, %225 : vector<8x1xf32>
    %227 = math.rsqrt %226 : vector<8x1xf32>
    %228 = vector.broadcast %227 : vector<8x1xf32> to vector<8x32xf32>
    %229 = arith.mulf %219, %228 : vector<8x32xf32>
    %230 = vector.broadcast %8 : vector<1x32xf32> to vector<8x32xf32>
    %231 = arith.mulf %229, %230 : vector<8x32xf32>
    %232 = vector.broadcast %9 : vector<1x32xf32> to vector<8x32xf32>
    %233 = arith.addf %231, %232 : vector<8x32xf32>
    %234 = arith.truncf %233 : vector<8x32xf32> to vector<8x32xbf16>
    %cst_145 = arith.constant dense<0.000000e+00> : vector<8x128xf32>
    %235 = tpu.matmul %234, %13, %cst_145 {dimension_numbers = #tpu.dot_dimension_numbers<[1], [0], [0], [1], [0, 0, 1, 1], [], []>} : vector<8x32xbf16>, vector<32x128xbf16>, vector<8x128xf32> -> vector<8x128xf32>
    %236 = vector.broadcast %11 : vector<1x128xf32> to vector<8x128xf32>
    %237 = arith.addf %235, %236 : vector<8x128xf32>
    %cst_146 = arith.constant 5.000000e-01 : f32
    %238 = vector.broadcast %cst_146 : f32 to vector<8x128xf32>
    %239 = arith.mulf %238, %237 : vector<8x128xf32>
    %cst_147 = arith.constant 4.471500e-02 : f32
    %240 = vector.broadcast %cst_147 : f32 to vector<8x128xf32>
    %241 = arith.mulf %240, %237 : vector<8x128xf32>
    %242 = arith.mulf %241, %237 : vector<8x128xf32>
    %243 = arith.mulf %242, %237 : vector<8x128xf32>
    %244 = arith.addf %237, %243 : vector<8x128xf32>
    %cst_148 = arith.constant 0.797884583 : f32
    %245 = vector.broadcast %cst_148 : f32 to vector<8x128xf32>
    %246 = arith.mulf %245, %244 : vector<8x128xf32>
    %247 = math.tanh %246 : vector<8x128xf32>
    %cst_149 = arith.constant 1.000000e+00 : f32
    %248 = vector.broadcast %cst_149 : f32 to vector<8x128xf32>
    %249 = arith.addf %248, %247 : vector<8x128xf32>
    %250 = arith.mulf %239, %249 : vector<8x128xf32>
    %251 = arith.truncf %250 : vector<8x128xf32> to vector<8x128xbf16>
    %cst_150 = arith.constant dense<0.000000e+00> : vector<8x32xf32>
    %252 = tpu.matmul %251, %14, %cst_150 {dimension_numbers = #tpu.dot_dimension_numbers<[1], [0], [0], [1], [0, 0, 1, 1], [], []>} : vector<8x128xbf16>, vector<128x32xbf16>, vector<8x32xf32> -> vector<8x32xf32>
    %253 = vector.broadcast %12 : vector<1x32xf32> to vector<8x32xf32>
    %254 = arith.addf %252, %253 : vector<8x32xf32>
    %255 = arith.addf %213, %254 : vector<8x32xf32>
    %c0_151 = arith.constant 0 : index
    %c0_152 = arith.constant 0 : index
    %c0_153 = arith.constant 0 : index
    %256 = vector.load %arg18[%c0_151, %c0_152, %c0_153] : memref<2x8x32xf32, #tpu.memory_space<vmem>>, vector<1x8x32xf32>
    %257 = vector.shape_cast %256 : vector<1x8x32xf32> to vector<8x32xf32>
    %258 = vector.shape_cast %255 : vector<8x32xf32> to vector<1x8x32xf32>
    tpu.vector_store %arg18[%c0_151, %c0_152, %c0_153], %258 {strides = array<i32>} : memref<2x8x32xf32, #tpu.memory_space<vmem>>, vector<1x8x32xf32>,
    %c1_154 = arith.constant 1 : index
    %c0_155 = arith.constant 0 : index
    %c0_156 = arith.constant 0 : index
    %259 = vector.load %arg1[%c1_154, %c0_155, %c0_156] : memref<2x8x32xf32, #tpu.memory_space<vmem>>, vector<1x8x32xf32>
    %260 = vector.shape_cast %259 : vector<1x8x32xf32> to vector<8x32xf32>
    %cst_157 = arith.constant dense<0.000000e+00> : vector<8xf32>
    %261 = vector.multi_reduction <add>, %260, %cst_157 [1] : vector<8x32xf32> to vector<8xf32>
    %262 = vector.shape_cast %261 : vector<8xf32> to vector<8x1xf32>
    %cst_158 = arith.constant 3.200000e+01 : f32
    %263 = vector.broadcast %cst_158 : f32 to vector<8x1xf32>
    %264 = arith.divf %262, %263 : vector<8x1xf32>
    %265 = vector.broadcast %264 : vector<8x1xf32> to vector<8x32xf32>
    %266 = arith.subf %260, %265 : vector<8x32xf32>
    %267 = arith.mulf %266, %266 : vector<8x32xf32>
    %cst_159 = arith.constant dense<0.000000e+00> : vector<8xf32>
    %268 = vector.multi_reduction <add>, %267, %cst_159 [1] : vector<8x32xf32> to vector<8xf32>
    %269 = vector.shape_cast %268 : vector<8xf32> to vector<8x1xf32>
    %cst_160 = arith.constant 3.200000e+01 : f32
    %270 = vector.broadcast %cst_160 : f32 to vector<8x1xf32>
    %271 = arith.divf %269, %270 : vector<8x1xf32>
    %cst_161 = arith.constant 9.99999974E-6 : f32
    %272 = vector.broadcast %cst_161 : f32 to vector<8x1xf32>
    %273 = arith.addf %271, %272 : vector<8x1xf32>
    %274 = math.rsqrt %273 : vector<8x1xf32>
    %275 = vector.broadcast %274 : vector<8x1xf32> to vector<8x32xf32>
    %276 = arith.mulf %266, %275 : vector<8x32xf32>
    %277 = vector.broadcast %6 : vector<1x32xf32> to vector<8x32xf32>
    %278 = arith.mulf %276, %277 : vector<8x32xf32>
    %279 = vector.broadcast %7 : vector<1x32xf32> to vector<8x32xf32>
    %280 = arith.addf %278, %279 : vector<8x32xf32>
    %281 = arith.truncf %280 : vector<8x32xf32> to vector<8x32xbf16>
    %cst_162 = arith.constant 0.000000e+00 : f32
    %282 = vector.broadcast %cst_162 : f32 to vector<8x32xf32>
    %c0_163 = arith.constant 0 : index
    %c0_164 = arith.constant 0 : index
    %c0_165 = arith.constant 0 : index
    %283 = vector.load %arg4[%c0_163, %c0_164, %c0_165] : memref<4x32x8xbf16, #tpu.memory_space<vmem>>, vector<1x32x8xbf16>
    %284 = vector.shape_cast %283 : vector<1x32x8xbf16> to vector<32x8xbf16>
    %cst_166 = arith.constant dense<0.000000e+00> : vector<8x8xf32>
    %285 = tpu.matmul %281, %284, %cst_166 {dimension_numbers = #tpu.dot_dimension_numbers<[1], [0], [0], [1], [0, 0, 1, 1], [], []>} : vector<8x32xbf16>, vector<32x8xbf16>, vector<8x8xf32> -> vector<8x8xf32>
    %c0_167 = arith.constant 0 : index
    %c0_168 = arith.constant 0 : index
    %c0_169 = arith.constant 0 : index
    %286 = vector.load %arg7[%c0_167, %c0_168, %c0_169] : memref<4x1x8xf32, #tpu.memory_space<vmem>>, vector<1x1x8xf32>
    %287 = vector.shape_cast %286 : vector<1x1x8xf32> to vector<1x8xf32>
    %288 = vector.broadcast %287 : vector<1x8xf32> to vector<8x8xf32>
    %289 = arith.addf %285, %288 : vector<8x8xf32>
    %c0_170 = arith.constant 0 : index
    %c0_171 = arith.constant 0 : index
    %c0_172 = arith.constant 0 : index
    %290 = vector.load %arg5[%c0_170, %c0_171, %c0_172] : memref<4x32x8xbf16, #tpu.memory_space<vmem>>, vector<1x32x8xbf16>
    %291 = vector.shape_cast %290 : vector<1x32x8xbf16> to vector<32x8xbf16>
    %cst_173 = arith.constant dense<0.000000e+00> : vector<8x8xf32>
    %292 = tpu.matmul %281, %291, %cst_173 {dimension_numbers = #tpu.dot_dimension_numbers<[1], [0], [0], [1], [0, 0, 1, 1], [], []>} : vector<8x32xbf16>, vector<32x8xbf16>, vector<8x8xf32> -> vector<8x8xf32>
    %c0_174 = arith.constant 0 : index
    %c0_175 = arith.constant 0 : index
    %c0_176 = arith.constant 0 : index
    %293 = vector.load %arg8[%c0_174, %c0_175, %c0_176] : memref<4x1x8xf32, #tpu.memory_space<vmem>>, vector<1x1x8xf32>
    %294 = vector.shape_cast %293 : vector<1x1x8xf32> to vector<1x8xf32>
    %295 = vector.broadcast %294 : vector<1x8xf32> to vector<8x8xf32>
    %296 = arith.addf %292, %295 : vector<8x8xf32>
    %c0_177 = arith.constant 0 : index
    %c0_178 = arith.constant 0 : index
    %c0_179 = arith.constant 0 : index
    %297 = vector.load %arg6[%c0_177, %c0_178, %c0_179] : memref<4x32x8xbf16, #tpu.memory_space<vmem>>, vector<1x32x8xbf16>
    %298 = vector.shape_cast %297 : vector<1x32x8xbf16> to vector<32x8xbf16>
    %cst_180 = arith.constant dense<0.000000e+00> : vector<8x8xf32>
    %299 = tpu.matmul %281, %298, %cst_180 {dimension_numbers = #tpu.dot_dimension_numbers<[1], [0], [0], [1], [0, 0, 1, 1], [], []>} : vector<8x32xbf16>, vector<32x8xbf16>, vector<8x8xf32> -> vector<8x8xf32>
    %c0_181 = arith.constant 0 : index
    %c0_182 = arith.constant 0 : index
    %c0_183 = arith.constant 0 : index
    %300 = vector.load %arg9[%c0_181, %c0_182, %c0_183] : memref<4x1x8xf32, #tpu.memory_space<vmem>>, vector<1x1x8xf32>
    %301 = vector.shape_cast %300 : vector<1x1x8xf32> to vector<1x8xf32>
    %302 = vector.broadcast %301 : vector<1x8xf32> to vector<8x8xf32>
    %303 = arith.addf %299, %302 : vector<8x8xf32>
    %304 = arith.truncf %289 : vector<8x8xf32> to vector<8x8xbf16>
    %305 = arith.truncf %296 : vector<8x8xf32> to vector<8x8xbf16>
    %cst_184 = arith.constant dense<0.000000e+00> : vector<8x8xf32>
    %306 = tpu.matmul %304, %305, %cst_184 {dimension_numbers = #tpu.dot_dimension_numbers<[1], [1], [0], [0], [0, 0, 1, 0], [], []>} : vector<8x8xbf16>, vector<8x8xbf16>, vector<8x8xf32> -> vector<8x8xf32>
    %307 = arith.addf %306, %5 : vector<8x8xf32>
    %cst_185 = arith.constant dense<0xFF800000> : vector<8xf32>
    %308 = vector.multi_reduction <maximumf>, %307, %cst_185 [1] : vector<8x8xf32> to vector<8xf32>
    %309 = vector.shape_cast %308 : vector<8xf32> to vector<8x1xf32>
    %310 = vector.broadcast %309 : vector<8x1xf32> to vector<8x8xf32>
    %311 = arith.subf %307, %310 : vector<8x8xf32>
    %312 = math.exp %311 : vector<8x8xf32>
    %cst_186 = arith.constant dense<0.000000e+00> : vector<8xf32>
    %313 = vector.multi_reduction <add>, %312, %cst_186 [1] : vector<8x8xf32> to vector<8xf32>
    %314 = vector.shape_cast %313 : vector<8xf32> to vector<8x1xf32>
    %315 = tpu.reciprocal %314 {approx = true} : vector<8x1xf32> -> vector<8x1xf32>
    %316 = vector.broadcast %315 : vector<8x1xf32> to vector<8x8xf32>
    %317 = arith.mulf %312, %316 : vector<8x8xf32>
    %318 = arith.truncf %317 : vector<8x8xf32> to vector<8x8xbf16>
    %319 = arith.truncf %303 : vector<8x8xf32> to vector<8x8xbf16>
    %cst_187 = arith.constant dense<0.000000e+00> : vector<8x8xf32>
    %320 = tpu.matmul %318, %319, %cst_187 {dimension_numbers = #tpu.dot_dimension_numbers<[1], [0], [0], [1], [0, 0, 1, 1], [], []>} : vector<8x8xbf16>, vector<8x8xbf16>, vector<8x8xf32> -> vector<8x8xf32>
    %321 = arith.truncf %320 : vector<8x8xf32> to vector<8x8xbf16>
    %c0_188 = arith.constant 0 : index
    %c0_189 = arith.constant 0 : index
    %c0_190 = arith.constant 0 : index
    %322 = vector.load %arg10[%c0_188, %c0_189, %c0_190] : memref<4x8x32xbf16, #tpu.memory_space<vmem>>, vector<1x8x32xbf16>
    %323 = vector.shape_cast %322 : vector<1x8x32xbf16> to vector<8x32xbf16>
    %cst_191 = arith.constant dense<0.000000e+00> : vector<8x32xf32>
    %324 = tpu.matmul %321, %323, %cst_191 {dimension_numbers = #tpu.dot_dimension_numbers<[1], [0], [0], [1], [0, 0, 1, 1], [], []>} : vector<8x8xbf16>, vector<8x32xbf16>, vector<8x32xf32> -> vector<8x32xf32>
    %325 = arith.addf %282, %324 : vector<8x32xf32>
    %c1_192 = arith.constant 1 : index
    %c0_193 = arith.constant 0 : index
    %c0_194 = arith.constant 0 : index
    %326 = vector.load %arg4[%c1_192, %c0_193, %c0_194] : memref<4x32x8xbf16, #tpu.memory_space<vmem>>, vector<1x32x8xbf16>
    %327 = vector.shape_cast %326 : vector<1x32x8xbf16> to vector<32x8xbf16>
    %cst_195 = arith.constant dense<0.000000e+00> : vector<8x8xf32>
    %328 = tpu.matmul %281, %327, %cst_195 {dimension_numbers = #tpu.dot_dimension_numbers<[1], [0], [0], [1], [0, 0, 1, 1], [], []>} : vector<8x32xbf16>, vector<32x8xbf16>, vector<8x8xf32> -> vector<8x8xf32>
    %c1_196 = arith.constant 1 : index
    %c0_197 = arith.constant 0 : index
    %c0_198 = arith.constant 0 : index
    %329 = vector.load %arg7[%c1_196, %c0_197, %c0_198] : memref<4x1x8xf32, #tpu.memory_space<vmem>>, vector<1x1x8xf32>
    %330 = vector.shape_cast %329 : vector<1x1x8xf32> to vector<1x8xf32>
    %331 = vector.broadcast %330 : vector<1x8xf32> to vector<8x8xf32>
    %332 = arith.addf %328, %331 : vector<8x8xf32>
    %c1_199 = arith.constant 1 : index
    %c0_200 = arith.constant 0 : index
    %c0_201 = arith.constant 0 : index
    %333 = vector.load %arg5[%c1_199, %c0_200, %c0_201] : memref<4x32x8xbf16, #tpu.memory_space<vmem>>, vector<1x32x8xbf16>
    %334 = vector.shape_cast %333 : vector<1x32x8xbf16> to vector<32x8xbf16>
    %cst_202 = arith.constant dense<0.000000e+00> : vector<8x8xf32>
    %335 = tpu.matmul %281, %334, %cst_202 {dimension_numbers = #tpu.dot_dimension_numbers<[1], [0], [0], [1], [0, 0, 1, 1], [], []>} : vector<8x32xbf16>, vector<32x8xbf16>, vector<8x8xf32> -> vector<8x8xf32>
    %c1_203 = arith.constant 1 : index
    %c0_204 = arith.constant 0 : index
    %c0_205 = arith.constant 0 : index
    %336 = vector.load %arg8[%c1_203, %c0_204, %c0_205] : memref<4x1x8xf32, #tpu.memory_space<vmem>>, vector<1x1x8xf32>
    %337 = vector.shape_cast %336 : vector<1x1x8xf32> to vector<1x8xf32>
    %338 = vector.broadcast %337 : vector<1x8xf32> to vector<8x8xf32>
    %339 = arith.addf %335, %338 : vector<8x8xf32>
    %c1_206 = arith.constant 1 : index
    %c0_207 = arith.constant 0 : index
    %c0_208 = arith.constant 0 : index
    %340 = vector.load %arg6[%c1_206, %c0_207, %c0_208] : memref<4x32x8xbf16, #tpu.memory_space<vmem>>, vector<1x32x8xbf16>
    %341 = vector.shape_cast %340 : vector<1x32x8xbf16> to vector<32x8xbf16>
    %cst_209 = arith.constant dense<0.000000e+00> : vector<8x8xf32>
    %342 = tpu.matmul %281, %341, %cst_209 {dimension_numbers = #tpu.dot_dimension_numbers<[1], [0], [0], [1], [0, 0, 1, 1], [], []>} : vector<8x32xbf16>, vector<32x8xbf16>, vector<8x8xf32> -> vector<8x8xf32>
    %c1_210 = arith.constant 1 : index
    %c0_211 = arith.constant 0 : index
    %c0_212 = arith.constant 0 : index
    %343 = vector.load %arg9[%c1_210, %c0_211, %c0_212] : memref<4x1x8xf32, #tpu.memory_space<vmem>>, vector<1x1x8xf32>
    %344 = vector.shape_cast %343 : vector<1x1x8xf32> to vector<1x8xf32>
    %345 = vector.broadcast %344 : vector<1x8xf32> to vector<8x8xf32>
    %346 = arith.addf %342, %345 : vector<8x8xf32>
    %347 = arith.truncf %332 : vector<8x8xf32> to vector<8x8xbf16>
    %348 = arith.truncf %339 : vector<8x8xf32> to vector<8x8xbf16>
    %cst_213 = arith.constant dense<0.000000e+00> : vector<8x8xf32>
    %349 = tpu.matmul %347, %348, %cst_213 {dimension_numbers = #tpu.dot_dimension_numbers<[1], [1], [0], [0], [0, 0, 1, 0], [], []>} : vector<8x8xbf16>, vector<8x8xbf16>, vector<8x8xf32> -> vector<8x8xf32>
    %350 = arith.addf %349, %5 : vector<8x8xf32>
    %cst_214 = arith.constant dense<0xFF800000> : vector<8xf32>
    %351 = vector.multi_reduction <maximumf>, %350, %cst_214 [1] : vector<8x8xf32> to vector<8xf32>
    %352 = vector.shape_cast %351 : vector<8xf32> to vector<8x1xf32>
    %353 = vector.broadcast %352 : vector<8x1xf32> to vector<8x8xf32>
    %354 = arith.subf %350, %353 : vector<8x8xf32>
    %355 = math.exp %354 : vector<8x8xf32>
    %cst_215 = arith.constant dense<0.000000e+00> : vector<8xf32>
    %356 = vector.multi_reduction <add>, %355, %cst_215 [1] : vector<8x8xf32> to vector<8xf32>
    %357 = vector.shape_cast %356 : vector<8xf32> to vector<8x1xf32>
    %358 = tpu.reciprocal %357 {approx = true} : vector<8x1xf32> -> vector<8x1xf32>
    %359 = vector.broadcast %358 : vector<8x1xf32> to vector<8x8xf32>
    %360 = arith.mulf %355, %359 : vector<8x8xf32>
    %361 = arith.truncf %360 : vector<8x8xf32> to vector<8x8xbf16>
    %362 = arith.truncf %346 : vector<8x8xf32> to vector<8x8xbf16>
    %cst_216 = arith.constant dense<0.000000e+00> : vector<8x8xf32>
    %363 = tpu.matmul %361, %362, %cst_216 {dimension_numbers = #tpu.dot_dimension_numbers<[1], [0], [0], [1], [0, 0, 1, 1], [], []>} : vector<8x8xbf16>, vector<8x8xbf16>, vector<8x8xf32> -> vector<8x8xf32>
    %364 = arith.truncf %363 : vector<8x8xf32> to vector<8x8xbf16>
    %c1_217 = arith.constant 1 : index
    %c0_218 = arith.constant 0 : index
    %c0_219 = arith.constant 0 : index
    %365 = vector.load %arg10[%c1_217, %c0_218, %c0_219] : memref<4x8x32xbf16, #tpu.memory_space<vmem>>, vector<1x8x32xbf16>
    %366 = vector.shape_cast %365 : vector<1x8x32xbf16> to vector<8x32xbf16>
    %cst_220 = arith.constant dense<0.000000e+00> : vector<8x32xf32>
    %367 = tpu.matmul %364, %366, %cst_220 {dimension_numbers = #tpu.dot_dimension_numbers<[1], [0], [0], [1], [0, 0, 1, 1], [], []>} : vector<8x8xbf16>, vector<8x32xbf16>, vector<8x32xf32> -> vector<8x32xf32>
    %368 = arith.addf %325, %367 : vector<8x32xf32>
    %c2_221 = arith.constant 2 : index
    %c0_222 = arith.constant 0 : index
    %c0_223 = arith.constant 0 : index
    %369 = vector.load %arg4[%c2_221, %c0_222, %c0_223] : memref<4x32x8xbf16, #tpu.memory_space<vmem>>, vector<1x32x8xbf16>
    %370 = vector.shape_cast %369 : vector<1x32x8xbf16> to vector<32x8xbf16>
    %cst_224 = arith.constant dense<0.000000e+00> : vector<8x8xf32>
    %371 = tpu.matmul %281, %370, %cst_224 {dimension_numbers = #tpu.dot_dimension_numbers<[1], [0], [0], [1], [0, 0, 1, 1], [], []>} : vector<8x32xbf16>, vector<32x8xbf16>, vector<8x8xf32> -> vector<8x8xf32>
    %c2_225 = arith.constant 2 : index
    %c0_226 = arith.constant 0 : index
    %c0_227 = arith.constant 0 : index
    %372 = vector.load %arg7[%c2_225, %c0_226, %c0_227] : memref<4x1x8xf32, #tpu.memory_space<vmem>>, vector<1x1x8xf32>
    %373 = vector.shape_cast %372 : vector<1x1x8xf32> to vector<1x8xf32>
    %374 = vector.broadcast %373 : vector<1x8xf32> to vector<8x8xf32>
    %375 = arith.addf %371, %374 : vector<8x8xf32>
    %c2_228 = arith.constant 2 : index
    %c0_229 = arith.constant 0 : index
    %c0_230 = arith.constant 0 : index
    %376 = vector.load %arg5[%c2_228, %c0_229, %c0_230] : memref<4x32x8xbf16, #tpu.memory_space<vmem>>, vector<1x32x8xbf16>
    %377 = vector.shape_cast %376 : vector<1x32x8xbf16> to vector<32x8xbf16>
    %cst_231 = arith.constant dense<0.000000e+00> : vector<8x8xf32>
    %378 = tpu.matmul %281, %377, %cst_231 {dimension_numbers = #tpu.dot_dimension_numbers<[1], [0], [0], [1], [0, 0, 1, 1], [], []>} : vector<8x32xbf16>, vector<32x8xbf16>, vector<8x8xf32> -> vector<8x8xf32>
    %c2_232 = arith.constant 2 : index
    %c0_233 = arith.constant 0 : index
    %c0_234 = arith.constant 0 : index
    %379 = vector.load %arg8[%c2_232, %c0_233, %c0_234] : memref<4x1x8xf32, #tpu.memory_space<vmem>>, vector<1x1x8xf32>
    %380 = vector.shape_cast %379 : vector<1x1x8xf32> to vector<1x8xf32>
    %381 = vector.broadcast %380 : vector<1x8xf32> to vector<8x8xf32>
    %382 = arith.addf %378, %381 : vector<8x8xf32>
    %c2_235 = arith.constant 2 : index
    %c0_236 = arith.constant 0 : index
    %c0_237 = arith.constant 0 : index
    %383 = vector.load %arg6[%c2_235, %c0_236, %c0_237] : memref<4x32x8xbf16, #tpu.memory_space<vmem>>, vector<1x32x8xbf16>
    %384 = vector.shape_cast %383 : vector<1x32x8xbf16> to vector<32x8xbf16>
    %cst_238 = arith.constant dense<0.000000e+00> : vector<8x8xf32>
    %385 = tpu.matmul %281, %384, %cst_238 {dimension_numbers = #tpu.dot_dimension_numbers<[1], [0], [0], [1], [0, 0, 1, 1], [], []>} : vector<8x32xbf16>, vector<32x8xbf16>, vector<8x8xf32> -> vector<8x8xf32>
    %c2_239 = arith.constant 2 : index
    %c0_240 = arith.constant 0 : index
    %c0_241 = arith.constant 0 : index
    %386 = vector.load %arg9[%c2_239, %c0_240, %c0_241] : memref<4x1x8xf32, #tpu.memory_space<vmem>>, vector<1x1x8xf32>
    %387 = vector.shape_cast %386 : vector<1x1x8xf32> to vector<1x8xf32>
    %388 = vector.broadcast %387 : vector<1x8xf32> to vector<8x8xf32>
    %389 = arith.addf %385, %388 : vector<8x8xf32>
    %390 = arith.truncf %375 : vector<8x8xf32> to vector<8x8xbf16>
    %391 = arith.truncf %382 : vector<8x8xf32> to vector<8x8xbf16>
    %cst_242 = arith.constant dense<0.000000e+00> : vector<8x8xf32>
    %392 = tpu.matmul %390, %391, %cst_242 {dimension_numbers = #tpu.dot_dimension_numbers<[1], [1], [0], [0], [0, 0, 1, 0], [], []>} : vector<8x8xbf16>, vector<8x8xbf16>, vector<8x8xf32> -> vector<8x8xf32>
    %393 = arith.addf %392, %5 : vector<8x8xf32>
    %cst_243 = arith.constant dense<0xFF800000> : vector<8xf32>
    %394 = vector.multi_reduction <maximumf>, %393, %cst_243 [1] : vector<8x8xf32> to vector<8xf32>
    %395 = vector.shape_cast %394 : vector<8xf32> to vector<8x1xf32>
    %396 = vector.broadcast %395 : vector<8x1xf32> to vector<8x8xf32>
    %397 = arith.subf %393, %396 : vector<8x8xf32>
    %398 = math.exp %397 : vector<8x8xf32>
    %cst_244 = arith.constant dense<0.000000e+00> : vector<8xf32>
    %399 = vector.multi_reduction <add>, %398, %cst_244 [1] : vector<8x8xf32> to vector<8xf32>
    %400 = vector.shape_cast %399 : vector<8xf32> to vector<8x1xf32>
    %401 = tpu.reciprocal %400 {approx = true} : vector<8x1xf32> -> vector<8x1xf32>
    %402 = vector.broadcast %401 : vector<8x1xf32> to vector<8x8xf32>
    %403 = arith.mulf %398, %402 : vector<8x8xf32>
    %404 = arith.truncf %403 : vector<8x8xf32> to vector<8x8xbf16>
    %405 = arith.truncf %389 : vector<8x8xf32> to vector<8x8xbf16>
    %cst_245 = arith.constant dense<0.000000e+00> : vector<8x8xf32>
    %406 = tpu.matmul %404, %405, %cst_245 {dimension_numbers = #tpu.dot_dimension_numbers<[1], [0], [0], [1], [0, 0, 1, 1], [], []>} : vector<8x8xbf16>, vector<8x8xbf16>, vector<8x8xf32> -> vector<8x8xf32>
    %407 = arith.truncf %406 : vector<8x8xf32> to vector<8x8xbf16>
    %c2_246 = arith.constant 2 : index
    %c0_247 = arith.constant 0 : index
    %c0_248 = arith.constant 0 : index
    %408 = vector.load %arg10[%c2_246, %c0_247, %c0_248] : memref<4x8x32xbf16, #tpu.memory_space<vmem>>, vector<1x8x32xbf16>
    %409 = vector.shape_cast %408 : vector<1x8x32xbf16> to vector<8x32xbf16>
    %cst_249 = arith.constant dense<0.000000e+00> : vector<8x32xf32>
    %410 = tpu.matmul %407, %409, %cst_249 {dimension_numbers = #tpu.dot_dimension_numbers<[1], [0], [0], [1], [0, 0, 1, 1], [], []>} : vector<8x8xbf16>, vector<8x32xbf16>, vector<8x32xf32> -> vector<8x32xf32>
    %411 = arith.addf %368, %410 : vector<8x32xf32>
    %c3_250 = arith.constant 3 : index
    %c0_251 = arith.constant 0 : index
    %c0_252 = arith.constant 0 : index
    %412 = vector.load %arg4[%c3_250, %c0_251, %c0_252] : memref<4x32x8xbf16, #tpu.memory_space<vmem>>, vector<1x32x8xbf16>
    %413 = vector.shape_cast %412 : vector<1x32x8xbf16> to vector<32x8xbf16>
    %cst_253 = arith.constant dense<0.000000e+00> : vector<8x8xf32>
    %414 = tpu.matmul %281, %413, %cst_253 {dimension_numbers = #tpu.dot_dimension_numbers<[1], [0], [0], [1], [0, 0, 1, 1], [], []>} : vector<8x32xbf16>, vector<32x8xbf16>, vector<8x8xf32> -> vector<8x8xf32>
    %c3_254 = arith.constant 3 : index
    %c0_255 = arith.constant 0 : index
    %c0_256 = arith.constant 0 : index
    %415 = vector.load %arg7[%c3_254, %c0_255, %c0_256] : memref<4x1x8xf32, #tpu.memory_space<vmem>>, vector<1x1x8xf32>
    %416 = vector.shape_cast %415 : vector<1x1x8xf32> to vector<1x8xf32>
    %417 = vector.broadcast %416 : vector<1x8xf32> to vector<8x8xf32>
    %418 = arith.addf %414, %417 : vector<8x8xf32>
    %c3_257 = arith.constant 3 : index
    %c0_258 = arith.constant 0 : index
    %c0_259 = arith.constant 0 : index
    %419 = vector.load %arg5[%c3_257, %c0_258, %c0_259] : memref<4x32x8xbf16, #tpu.memory_space<vmem>>, vector<1x32x8xbf16>
    %420 = vector.shape_cast %419 : vector<1x32x8xbf16> to vector<32x8xbf16>
    %cst_260 = arith.constant dense<0.000000e+00> : vector<8x8xf32>
    %421 = tpu.matmul %281, %420, %cst_260 {dimension_numbers = #tpu.dot_dimension_numbers<[1], [0], [0], [1], [0, 0, 1, 1], [], []>} : vector<8x32xbf16>, vector<32x8xbf16>, vector<8x8xf32> -> vector<8x8xf32>
    %c3_261 = arith.constant 3 : index
    %c0_262 = arith.constant 0 : index
    %c0_263 = arith.constant 0 : index
    %422 = vector.load %arg8[%c3_261, %c0_262, %c0_263] : memref<4x1x8xf32, #tpu.memory_space<vmem>>, vector<1x1x8xf32>
    %423 = vector.shape_cast %422 : vector<1x1x8xf32> to vector<1x8xf32>
    %424 = vector.broadcast %423 : vector<1x8xf32> to vector<8x8xf32>
    %425 = arith.addf %421, %424 : vector<8x8xf32>
    %c3_264 = arith.constant 3 : index
    %c0_265 = arith.constant 0 : index
    %c0_266 = arith.constant 0 : index
    %426 = vector.load %arg6[%c3_264, %c0_265, %c0_266] : memref<4x32x8xbf16, #tpu.memory_space<vmem>>, vector<1x32x8xbf16>
    %427 = vector.shape_cast %426 : vector<1x32x8xbf16> to vector<32x8xbf16>
    %cst_267 = arith.constant dense<0.000000e+00> : vector<8x8xf32>
    %428 = tpu.matmul %281, %427, %cst_267 {dimension_numbers = #tpu.dot_dimension_numbers<[1], [0], [0], [1], [0, 0, 1, 1], [], []>} : vector<8x32xbf16>, vector<32x8xbf16>, vector<8x8xf32> -> vector<8x8xf32>
    %c3_268 = arith.constant 3 : index
    %c0_269 = arith.constant 0 : index
    %c0_270 = arith.constant 0 : index
    %429 = vector.load %arg9[%c3_268, %c0_269, %c0_270] : memref<4x1x8xf32, #tpu.memory_space<vmem>>, vector<1x1x8xf32>
    %430 = vector.shape_cast %429 : vector<1x1x8xf32> to vector<1x8xf32>
    %431 = vector.broadcast %430 : vector<1x8xf32> to vector<8x8xf32>
    %432 = arith.addf %428, %431 : vector<8x8xf32>
    %433 = arith.truncf %418 : vector<8x8xf32> to vector<8x8xbf16>
    %434 = arith.truncf %425 : vector<8x8xf32> to vector<8x8xbf16>
    %cst_271 = arith.constant dense<0.000000e+00> : vector<8x8xf32>
    %435 = tpu.matmul %433, %434, %cst_271 {dimension_numbers = #tpu.dot_dimension_numbers<[1], [1], [0], [0], [0, 0, 1, 0], [], []>} : vector<8x8xbf16>, vector<8x8xbf16>, vector<8x8xf32> -> vector<8x8xf32>
    %436 = arith.addf %435, %5 : vector<8x8xf32>
    %cst_272 = arith.constant dense<0xFF800000> : vector<8xf32>
    %437 = vector.multi_reduction <maximumf>, %436, %cst_272 [1] : vector<8x8xf32> to vector<8xf32>
    %438 = vector.shape_cast %437 : vector<8xf32> to vector<8x1xf32>
    %439 = vector.broadcast %438 : vector<8x1xf32> to vector<8x8xf32>
    %440 = arith.subf %436, %439 : vector<8x8xf32>
    %441 = math.exp %440 : vector<8x8xf32>
    %cst_273 = arith.constant dense<0.000000e+00> : vector<8xf32>
    %442 = vector.multi_reduction <add>, %441, %cst_273 [1] : vector<8x8xf32> to vector<8xf32>
    %443 = vector.shape_cast %442 : vector<8xf32> to vector<8x1xf32>
    %444 = tpu.reciprocal %443 {approx = true} : vector<8x1xf32> -> vector<8x1xf32>
    %445 = vector.broadcast %444 : vector<8x1xf32> to vector<8x8xf32>
    %446 = arith.mulf %441, %445 : vector<8x8xf32>
    %447 = arith.truncf %446 : vector<8x8xf32> to vector<8x8xbf16>
    %448 = arith.truncf %432 : vector<8x8xf32> to vector<8x8xbf16>
    %cst_274 = arith.constant dense<0.000000e+00> : vector<8x8xf32>
    %449 = tpu.matmul %447, %448, %cst_274 {dimension_numbers = #tpu.dot_dimension_numbers<[1], [0], [0], [1], [0, 0, 1, 1], [], []>} : vector<8x8xbf16>, vector<8x8xbf16>, vector<8x8xf32> -> vector<8x8xf32>
    %450 = arith.truncf %449 : vector<8x8xf32> to vector<8x8xbf16>
    %c3_275 = arith.constant 3 : index
    %c0_276 = arith.constant 0 : index
    %c0_277 = arith.constant 0 : index
    %451 = vector.load %arg10[%c3_275, %c0_276, %c0_277] : memref<4x8x32xbf16, #tpu.memory_space<vmem>>, vector<1x8x32xbf16>
    %452 = vector.shape_cast %451 : vector<1x8x32xbf16> to vector<8x32xbf16>
    %cst_278 = arith.constant dense<0.000000e+00> : vector<8x32xf32>
    %453 = tpu.matmul %450, %452, %cst_278 {dimension_numbers = #tpu.dot_dimension_numbers<[1], [0], [0], [1], [0, 0, 1, 1], [], []>} : vector<8x8xbf16>, vector<8x32xbf16>, vector<8x32xf32> -> vector<8x32xf32>
    %454 = arith.addf %411, %453 : vector<8x32xf32>
    %455 = arith.addf %260, %454 : vector<8x32xf32>
    %456 = vector.broadcast %10 : vector<1x32xf32> to vector<8x32xf32>
    %457 = arith.addf %455, %456 : vector<8x32xf32>
    %cst_279 = arith.constant dense<0.000000e+00> : vector<8xf32>
    %458 = vector.multi_reduction <add>, %457, %cst_279 [1] : vector<8x32xf32> to vector<8xf32>
    %459 = vector.shape_cast %458 : vector<8xf32> to vector<8x1xf32>
    %cst_280 = arith.constant 3.200000e+01 : f32
    %460 = vector.broadcast %cst_280 : f32 to vector<8x1xf32>
    %461 = arith.divf %459, %460 : vector<8x1xf32>
    %462 = vector.broadcast %461 : vector<8x1xf32> to vector<8x32xf32>
    %463 = arith.subf %457, %462 : vector<8x32xf32>
    %464 = arith.mulf %463, %463 : vector<8x32xf32>
    %cst_281 = arith.constant dense<0.000000e+00> : vector<8xf32>
    %465 = vector.multi_reduction <add>, %464, %cst_281 [1] : vector<8x32xf32> to vector<8xf32>
    %466 = vector.shape_cast %465 : vector<8xf32> to vector<8x1xf32>
    %cst_282 = arith.constant 3.200000e+01 : f32
    %467 = vector.broadcast %cst_282 : f32 to vector<8x1xf32>
    %468 = arith.divf %466, %467 : vector<8x1xf32>
    %cst_283 = arith.constant 9.99999974E-6 : f32
    %469 = vector.broadcast %cst_283 : f32 to vector<8x1xf32>
    %470 = arith.addf %468, %469 : vector<8x1xf32>
    %471 = math.rsqrt %470 : vector<8x1xf32>
    %472 = vector.broadcast %471 : vector<8x1xf32> to vector<8x32xf32>
    %473 = arith.mulf %463, %472 : vector<8x32xf32>
    %474 = vector.broadcast %8 : vector<1x32xf32> to vector<8x32xf32>
    %475 = arith.mulf %473, %474 : vector<8x32xf32>
    %476 = vector.broadcast %9 : vector<1x32xf32> to vector<8x32xf32>
    %477 = arith.addf %475, %476 : vector<8x32xf32>
    %478 = arith.truncf %477 : vector<8x32xf32> to vector<8x32xbf16>
    %cst_284 = arith.constant dense<0.000000e+00> : vector<8x128xf32>
    %479 = tpu.matmul %478, %13, %cst_284 {dimension_numbers = #tpu.dot_dimension_numbers<[1], [0], [0], [1], [0, 0, 1, 1], [], []>} : vector<8x32xbf16>, vector<32x128xbf16>, vector<8x128xf32> -> vector<8x128xf32>
    %480 = vector.broadcast %11 : vector<1x128xf32> to vector<8x128xf32>
    %481 = arith.addf %479, %480 : vector<8x128xf32>
    %cst_285 = arith.constant 5.000000e-01 : f32
    %482 = vector.broadcast %cst_285 : f32 to vector<8x128xf32>
    %483 = arith.mulf %482, %481 : vector<8x128xf32>
    %cst_286 = arith.constant 4.471500e-02 : f32
    %484 = vector.broadcast %cst_286 : f32 to vector<8x128xf32>
    %485 = arith.mulf %484, %481 : vector<8x128xf32>
    %486 = arith.mulf %485, %481 : vector<8x128xf32>
    %487 = arith.mulf %486, %481 : vector<8x128xf32>
    %488 = arith.addf %481, %487 : vector<8x128xf32>
    %cst_287 = arith.constant 0.797884583 : f32
    %489 = vector.broadcast %cst_287 : f32 to vector<8x128xf32>
    %490 = arith.mulf %489, %488 : vector<8x128xf32>
    %491 = math.tanh %490 : vector<8x128xf32>
    %cst_288 = arith.constant 1.000000e+00 : f32
    %492 = vector.broadcast %cst_288 : f32 to vector<8x128xf32>
    %493 = arith.addf %492, %491 : vector<8x128xf32>
    %494 = arith.mulf %483, %493 : vector<8x128xf32>
    %495 = arith.truncf %494 : vector<8x128xf32> to vector<8x128xbf16>
    %cst_289 = arith.constant dense<0.000000e+00> : vector<8x32xf32>
    %496 = tpu.matmul %495, %14, %cst_289 {dimension_numbers = #tpu.dot_dimension_numbers<[1], [0], [0], [1], [0, 0, 1, 1], [], []>} : vector<8x128xbf16>, vector<128x32xbf16>, vector<8x32xf32> -> vector<8x32xf32>
    %497 = vector.broadcast %12 : vector<1x32xf32> to vector<8x32xf32>
    %498 = arith.addf %496, %497 : vector<8x32xf32>
    %499 = arith.addf %457, %498 : vector<8x32xf32>
    %c1_290 = arith.constant 1 : index
    %c0_291 = arith.constant 0 : index
    %c0_292 = arith.constant 0 : index
    %500 = vector.load %arg18[%c1_290, %c0_291, %c0_292] : memref<2x8x32xf32, #tpu.memory_space<vmem>>, vector<1x8x32xf32>
    %501 = vector.shape_cast %500 : vector<1x8x32xf32> to vector<8x32xf32>
    %502 = vector.shape_cast %499 : vector<8x32xf32> to vector<1x8x32xf32>
    tpu.vector_store %arg18[%c1_290, %c0_291, %c0_292], %502 {strides = array<i32>} : memref<2x8x32xf32, #tpu.memory_space<vmem>>, vector<1x8x32xf32>,
    return
  }
  func.func @transform_0(%arg0: i32) -> (i32, i32, i32) {
    %c0_i32 = arith.constant 0 : i32
    %c0_i32_0 = arith.constant 0 : i32
    %c0_i32_1 = arith.constant 0 : i32
    return %arg0, %c0_i32, %c0_i32_0 : i32, i32, i32
  }
  func.func @transform_1(%arg0: i32) -> (i32, i32) {
    %c0_i32 = arith.constant 0 : i32
    %c0_i32_0 = arith.constant 0 : i32
    %c0_i32_1 = arith.constant 0 : i32
    return %c0_i32, %c0_i32_0 : i32, i32
  }
  func.func @transform_2(%arg0: i32) -> (i32, i32) {
    %c0_i32 = arith.constant 0 : i32
    %c0_i32_0 = arith.constant 0 : i32
    %c0_i32_1 = arith.constant 0 : i32
    return %c0_i32, %c0_i32_0 : i32, i32
  }
  func.func @transform_3(%arg0: i32) -> (i32, i32, i32) {
    %c0_i32 = arith.constant 0 : i32
    %c0_i32_0 = arith.constant 0 : i32
    %c0_i32_1 = arith.constant 0 : i32
    %c0_i32_2 = arith.constant 0 : i32
    return %c0_i32, %c0_i32_0, %c0_i32_1 : i32, i32, i32
  }
  func.func @transform_4(%arg0: i32) -> (i32, i32, i32) {
    %c0_i32 = arith.constant 0 : i32
    %c0_i32_0 = arith.constant 0 : i32
    %c0_i32_1 = arith.constant 0 : i32
    %c0_i32_2 = arith.constant 0 : i32
    return %c0_i32, %c0_i32_0, %c0_i32_1 : i32, i32, i32
  }
  func.func @transform_5(%arg0: i32) -> (i32, i32, i32) {
    %c0_i32 = arith.constant 0 : i32
    %c0_i32_0 = arith.constant 0 : i32
    %c0_i32_1 = arith.constant 0 : i32
    %c0_i32_2 = arith.constant 0 : i32
    return %c0_i32, %c0_i32_0, %c0_i32_1 : i32, i32, i32
  }
  func.func @transform_6(%arg0: i32) -> (i32, i32, i32) {
    %c0_i32 = arith.constant 0 : i32
    %c0_i32_0 = arith.constant 0 : i32
    %c0_i32_1 = arith.constant 0 : i32
    %c0_i32_2 = arith.constant 0 : i32
    return %c0_i32, %c0_i32_0, %c0_i32_1 : i32, i32, i32
  }
  func.func @transform_7(%arg0: i32) -> (i32, i32, i32) {
    %c0_i32 = arith.constant 0 : i32
    %c0_i32_0 = arith.constant 0 : i32
    %c0_i32_1 = arith.constant 0 : i32
    %c0_i32_2 = arith.constant 0 : i32
    return %c0_i32, %c0_i32_0, %c0_i32_1 : i32, i32, i32
  }
  func.func @transform_8(%arg0: i32) -> (i32, i32, i32) {
    %c0_i32 = arith.constant 0 : i32
    %c0_i32_0 = arith.constant 0 : i32
    %c0_i32_1 = arith.constant 0 : i32
    %c0_i32_2 = arith.constant 0 : i32
    return %c0_i32, %c0_i32_0, %c0_i32_1 : i32, i32, i32
  }
  func.func @transform_9(%arg0: i32) -> (i32, i32, i32) {
    %c0_i32 = arith.constant 0 : i32
    %c0_i32_0 = arith.constant 0 : i32
    %c0_i32_1 = arith.constant 0 : i32
    %c0_i32_2 = arith.constant 0 : i32
    return %c0_i32, %c0_i32_0, %c0_i32_1 : i32, i32, i32
  }
  func.func @transform_10(%arg0: i32) -> (i32, i32) {
    %c0_i32 = arith.constant 0 : i32
    %c0_i32_0 = arith.constant 0 : i32
    %c0_i32_1 = arith.constant 0 : i32
    return %c0_i32, %c0_i32_0 : i32, i32
  }
  func.func @transform_11(%arg0: i32) -> (i32, i32) {
    %c0_i32 = arith.constant 0 : i32
    %c0_i32_0 = arith.constant 0 : i32
    %c0_i32_1 = arith.constant 0 : i32
    return %c0_i32, %c0_i32_0 : i32, i32
  }
  func.func @transform_12(%arg0: i32) -> (i32, i32) {
    %c0_i32 = arith.constant 0 : i32
    %c0_i32_0 = arith.constant 0 : i32
    %c0_i32_1 = arith.constant 0 : i32
    return %c0_i32, %c0_i32_0 : i32, i32
  }
  func.func @transform_13(%arg0: i32) -> (i32, i32) {
    %c0_i32 = arith.constant 0 : i32
    %c0_i32_0 = arith.constant 0 : i32
    %c0_i32_1 = arith.constant 0 : i32
    return %c0_i32, %c0_i32_0 : i32, i32
  }
  func.func @transform_14(%arg0: i32) -> (i32, i32) {
    %c0_i32 = arith.constant 0 : i32
    %c0_i32_0 = arith.constant 0 : i32
    %c0_i32_1 = arith.constant 0 : i32
    return %c0_i32, %c0_i32_0 : i32, i32
  }
  func.func @transform_15(%arg0: i32) -> (i32, i32) {
    %c0_i32 = arith.constant 0 : i32
    %c0_i32_0 = arith.constant 0 : i32
    %c0_i32_1 = arith.constant 0 : i32
    return %c0_i32, %c0_i32_0 : i32, i32
  }
  func.func @transform_16(%arg0: i32) -> (i32, i32) {
    %c0_i32 = arith.constant 0 : i32
    %c0_i32_0 = arith.constant 0 : i32
    %c0_i32_1 = arith.constant 0 : i32
    return %c0_i32, %c0_i32_0 : i32, i32
  }
  func.func @transform_17(%arg0: i32) -> (i32, i32, i32) {
    %c0_i32 = arith.constant 0 : i32
    %c0_i32_0 = arith.constant 0 : i32
    %c0_i32_1 = arith.constant 0 : i32
    return %arg0, %c0_i32, %c0_i32_0 : i32, i32, i32
  }
}

</mosaic_0001>

<bundles_post_ra>
// kernel: tpu_custom_call.1
= control target key start
LH: loop header
LB: loop body
LE: loop exit
PB: predicated region body
PF: predicated region fallthrough
CT: control target
= control target key end

     0   :  { %s2988_s0 = inlined_call_operand.vmem [shape: f32[2,8,32], index: 0, kind: input, shape index: {}]   ;;  %s2989_s1 = inlined_call_operand.vmem [shape: f32[1,32], index: 1, kind: input, shape index: {}]   ;;  %s2990_s2 = inlined_call_operand.vmem [shape: f32[1,32], index: 2, kind: input, shape index: {}]   ;;  %s2991_s3 = inlined_call_operand.vmem [shape: bf16[4,32,8], index: 3, kind: input, shape index: {}]   ;;  %s2992_s4 = inlined_call_operand.vmem [shape: bf16[4,32,8], index: 4, kind: input, shape index: {}]   ;;  %s2993_s5 = inlined_call_operand.vmem [shape: bf16[4,32,8], index: 5, kind: input, shape index: {}]   ;;  %s2994_s6 = inlined_call_operand.vmem [shape: f32[4,1,8], index: 6, kind: input, shape index: {}]   ;;  %s2995_s7 = inlined_call_operand.vmem [shape: f32[4,1,8], index: 7, kind: input, shape index: {}]   ;;  %s2996_s8 = inlined_call_operand.vmem [shape: f32[4,1,8], index: 8, kind: input, shape index: {}]   ;;  %s2997_s9 = inlined_call_operand.vmem [shape: bf16[4,8,32], index: 9, kind: input, shape index: {}]   ;;  %s2998_s10 = inlined_call_operand.vmem [shape: f32[1,32], index: 10, kind: input, shape index: {}]   ;;  %s2999_s11 = inlined_call_operand.vmem [shape: f32[1,32], index: 11, kind: input, shape index: {}]   ;;  %s3000_s12 = inlined_call_operand.vmem [shape: f32[1,32], index: 12, kind: input, shape index: {}]   ;;  %s3001_s13 = inlined_call_operand.vmem [shape: bf16[32,128], index: 13, kind: input, shape index: {}]   ;;  %s3002_s14 = inlined_call_operand.vmem [shape: f32[1,128], index: 14, kind: input, shape index: {}]   ;;  %s3003_s15 = inlined_call_operand.vmem [shape: bf16[128,32], index: 15, kind: input, shape index: {}]   ;;  %s3004_s16 = inlined_call_operand.vmem [shape: f32[1,32], index: 16, kind: input, shape index: {}]   ;;  %s3005_s17 = inlined_call_operand.hbm [shape: f32[2,8,32], index: 17, kind: output, shape index: {}]  }
   0x1   :  { %3007 = sst [smem:[#allocation5_spill]] %s2988_s0 }
   0x2   :  { %3008 = sst [smem:[#allocation6_spill]] %s2989_s1 }
   0x3   :  { %s3009_s26 = sld [smem:[#allocation5_spill]]  ;;  %vm92_vm0 = vcmask 261120  }
   0x9   :  { %v2448_v0 = vld [vmem:[%s3009_s26] sm:$0xff] }
   0xa   :  { %v93_v1 = vsel %vm92_vm0, %v2448_v0, 0.0 }
   0xb   :  { %94 = vadd.xlane.f32.xlu0 %v93_v1 }
   0xc   :  { %22 = vsyncpa [#allocation3], 0  ;;  %v2350_v2 = vmov 32.0   ;;  %v2195_v14 = vld [vmem:[%s2991_s3 + $0x8] sm:$0xff]  ;;  %v2194_v16 = vld [vmem:[%s2991_s3] sm:$0xff]  ;;  %s3010_s30 = sld [smem:[#allocation6_spill]] }
   0xd   :  { %2278 = vrcp.f32 %v2350_v2  ;;  %v2199_v15 = vld [vmem:[%s2993_s5 + $0x8] sm:$0xff]  ;;  %160 = vmatpush.bf16.msra.mxu1 %v2195_v14  ;;  %v2198_v17 = vld [vmem:[%s2993_s5] sm:$0xff]  ;;  %v2203_v19 = vld [vmem:[%s2992_s4 + $0x18] sm:$0xff]  ;;  %vm271_vm5 = vcmask 1043456   ;;  %vm235_vm6 = vcmask 64512   ;;  %s1793_s25 = sshll.u32 %s3005_s17, 4  ;;  %s1794_s25 = int_to_ptr.hbm [resolvable:$true] %s1793_s25 }
   0xe   :  { %226 = vmatpush.bf16.msra.mxu2 %v2199_v15  ;;  %v2197_v18 = vld [vmem:[%s2992_s4 + $0x8] sm:$0xff]  ;;  %v2196_v22 = vld [vmem:[%s2992_s4] sm:$0xff]  ;;  %v2202_v23 = vld [vmem:[%s2992_s4 + $0x10] sm:$0xff]  ;;  %s2353_s27 = smov 128   ;;  %s2354_s28 = smov 8  }
   0xf   :  { %v2490_v34 = vld [vmem:[%s2990_s2] ss:$0 sm:$0xff]  ;;  %v2201_v37 = vld [vmem:[%s2991_s3 + $0x18] sm:$0xff]  ;;  %v2200_v39 = vld [vmem:[%s2991_s3 + $0x10] sm:$0xff] }
  0x10   :  { %v2250_v41 = vld [vmem:[%s2996_s8] ss:$0 sm:$0xff]  ;;  %v2252_v53 = vld [vmem:[%s2995_s7 + $0x1] ss:$0 sm:$0xff]  ;;  %v2205_v54 = vld [vmem:[%s2993_s5 + $0x18] sm:$0xff] }
  0x11   :  { %161 = vmatpush.bf16.msra.mxu1 %v2194_v16  ;;  %v2251_v47 = vld [vmem:[%s2995_s7] ss:$0 sm:$0xff]  ;;  %v2204_v59 = vld [vmem:[%s2993_s5 + $0x10] sm:$0xff]  ;;  %v2254_v14 = vld [vmem:[%s2996_s8 + $0x1] ss:$0 sm:$0xff] }
  0x12   :  { %227 = vmatpush.bf16.msra.mxu2 %v2198_v17  ;;  %v2485_v31 = vld [vmem:[%s3010_s30] ss:$0 sm:$0xff] }
  0x13   :  { %v2279_v3 = vpop.eup %2278  ;;  %v2249_v51 = vld [vmem:[%s2994_s6] ss:$0 sm:$0xff] }
  0x14   :  { %v97_v4 = vmul.f32 32.0, %v2279_v3  ;;  %vm101_vm1 = vweird.f32 %v2279_v3 }
  0x15   :  { %193 = vmatpush.bf16.msrb.mxu1 %v2197_v18 }
  0x16   :  { %v98_v5 = vsub.f32 1.0, %v97_v4  ;;  %353 = vmatpush.bf16.msrb.mxu2 %v2203_v19  ;;  %v58_v4 = vlaneseq }
  0x18   :  { %v99_v6 = vmul.f32 %v2279_v3, %v98_v5  ;;  %v59_v5 = vshrl.u32 %v58_v4, 7 }
  0x19   :  { %194 = vmatpush.bf16.msrb.mxu1 %v2196_v22 }
  0x1a   :  { %v100_v7 = vadd.f32 %v2279_v3, %v99_v6  ;;  %354 = vmatpush.bf16.msrb.mxu2 %v2202_v23  ;;  %v61_v6 = vand.u32 127, %v58_v4 }
  0x1c   :  { %v2452_v8 = vsel %vm101_vm1, %v2279_v3, %v100_v7  ;;  %vm62_vm7 = vcmp.le.s32.totalorder %v61_v6, %v59_v5  ;;  %v2351_v7 = vmov -1e+30   ;;  %v2212_v5 = vld [vmem:[%s2991_s3 + $0x30] sm:$0xff] }
  0x7e   :  { %v95_v9 = vpop.xlane.xlu0 %94 }
  0x7f   :  { %v103_v10 = vmul.f32 %v2452_v8, %v95_v9  ;;  %v2536_v9 = vsel %vm62_vm7, 0.0, %v2351_v7  ;;  %v2256_v7 = vld [vmem:[%s2995_s7 + $0x2] ss:$0 sm:$0xff] }
  0x81   :  { %v104_v11 = vsub.f32 %v2448_v0, %v103_v10 }
  0x83   :  { %v105_v12 = vmul.f32 %v104_v11, %v104_v11 }
  0x85   :  { %v106_v13 = vsel %vm92_vm0, %v105_v12, 0.0 }
  0x86   :  { %107 = vadd.xlane.f32.xlu0 %v106_v13 }
  0xf9   :  { %v108_v20 = vpop.xlane.xlu0 %107 }
  0xfa   :  { %v109_v21 = vmul.f32 %v108_v20, %v2452_v8 }
  0xfc   :  { %v110_v24 = vadd.f32 1e-05, %v109_v21 }
  0xfe   :  { %2280 = vrsqrt.f32 %v110_v24  ;;  %vm117_vm3 = vweird.f32 %v110_v24 }
 0x104   :  { %v2281_v25 = vpop.eup %2280 }
 0x105   :  { %v112_v26 = vmul.f32 %v2281_v25, %v110_v24  ;;  %vm118_vm2 = vweird.f32 %v2281_v25 }
 0x106   :  { %vm119_vm4 = vmor %vm117_vm3, %vm118_vm2 }
 0x107   :  { %v113_v27 = vmul.f32 %v2281_v25, %v112_v26 }
 0x109   :  { %v114_v28 = vmul.f32 0.5, %v113_v27 }
 0x10b   :  { %v115_v29 = vsub.f32 1.5, %v114_v28  ;;  %v2207_v28 = vld [vmem:[%s2991_s3 + $0x28] sm:$0xff] }
 0x10d   :  { %v116_v30 = vmul.f32 %v2281_v25, %v115_v29 }
 0x10f   :  { %v120_v32 = vsel %vm119_vm4, %v2281_v25, %v116_v30  ;;  %v2206_v30 = vld [vmem:[%s2991_s3 + $0x20] sm:$0xff] }
 0x110   :  { %v121_v33 = vmul.f32 %v120_v32, %v104_v11  ;;  %v2253_v32 = vld [vmem:[%s2994_s6 + $0x1] ss:$0 sm:$0xff] }
 0x112   :  { %v125_v35 = vmul.f32 %v2485_v31, %v121_v33 }
 0x114   :  { %v129_v36 = vadd.f32 %v2490_v34, %v125_v35 }
 0x116   :  { %v2497_v38 = vpack.c.bf16 %v129_v36, %v129_v36  ;;  %v289_v36 = vld [vmem:[%s2997_s9] sm:$0xf] }
 0x118   :  { %1813 = vmatmul.msk.bf16.vlgmr.msra.gmra.mxu1 %vm92_vm0, %v2497_v38  ;;  %1831 = vmatmul.msk.bf16.vlgmr.msra.gmra.mxu2 %vm92_vm0, %v2497_v38 }
 0x119   :  { %318 = vmatpush.bf16.msra.mxu1 %v2201_v37  ;;  %v474_v37 = vsel %vm271_vm5, %v289_v36, 0 }
 0x11d   :  { %319 = vmatpush.bf16.msra.mxu1 %v2200_v39 }
 0x128   :  { %1822 = vmatmul.msk.bf16.vlgmr.msrb.gmra.mxu1 %vm92_vm0, %v2497_v38  ;;  %1861 = vmatmul.msk.bf16.vlgmr.msrb.gmra.mxu2 %vm92_vm0, %v2497_v38 }
 0x138   :  { %1847 = vmatmul.msk.bf16.vlgmr.msra.gmra.mxu1 %vm92_vm0, %v2497_v38 }
 0x195   :  { %v163_v40 = vpop.f32.mrf.mxu1 }
 0x196   :  { %v164_v57 = vadd.f32 %v2249_v51, %v163_v40 }
 0x198   :  { %v233_v62 = vpack.c.bf16 %v164_v57, %v164_v57 }
 0x19b   :  { %v229_v42 = vpop.f32.mrf.mxu2 }
 0x19c   :  { %v230_v43 = vadd.f32 %v2250_v41, %v229_v42 }
 0x19d   :  { %v165_v44 = vpop.f32.mrf.mxu1 }
 0x19e   :  { %v267_v45 = vpack.c.bf16 %v230_v43, %v230_v43 }
 0x1a0   :  { %v273_v46 = vsel %vm271_vm5, %v267_v45, 0 }
 0x1a1   :  { %282 = vmatpush.bf16.msra.mxu0 %v273_v46 }
 0x1a3   :  { %v231_v48 = vpop.f32.mrf.mxu2 }
 0x1a5   :  { %v196_v49 = vpop.f32.mrf.mxu1 }
 0x1a6   :  { %v197_v50 = vadd.f32 %v2251_v47, %v196_v49 }
 0x1a8   :  { %v234_v52 = vpack.c.bf16 %v197_v50, %v197_v50 }
 0x1aa   :  { %v240_v55 = vsel %vm235_vm6, %v234_v52, 0 }
 0x1ab   :  { %249 = vmatpush.bf16.xpose.msra.mxu3 %v240_v55  ;;  %v356_v56 = vpop.f32.mrf.mxu2  ;;  %v2209_v55 = vld [vmem:[%s2992_s4 + $0x28] sm:$0xff] }
 0x1ac   :  { %v357_v58 = vadd.f32 %v2252_v53, %v356_v56  ;;  %v2208_v56 = vld [vmem:[%s2992_s4 + $0x20] sm:$0xff] }
 0x1ad   :  { %v198_v60 = vpop.f32.mrf.mxu1 }
 0x1ae   :  { %v396_v61 = vpack.c.bf16 %v357_v58, %v357_v58 }
 0x1b0   :  { %v401_v63 = vsel %vm235_vm6, %v396_v61, 0  ;;  %v1878_v61 = vld [vmem:[%s2997_s9 + $0x4] sm:$0xf] }
 0x1b1   :  { %410 = vmatpush.bf16.xpose.msrb.mxu0 %v401_v63  ;;  %v2211_v63 = vld [vmem:[%s2993_s5 + $0x28] sm:$0xff] }
 0x1b2   :  { %1832 = vmatmul.msk.bf16.vlgmr.msra.gmra.mxu3 %vm235_vm6, %v233_v62  ;;  %v455_v62 = vsel %vm271_vm5, %v1878_v61, 0 }
 0x1b3   :  { %388 = vmatpush.bf16.msrb.mxu3 %v2205_v54  ;;  %v358_v1 = vpop.f32.mrf.mxu2  ;;  %464 = vmatpush.bf16.msra.mxu2 %v455_v62  ;;  %v2260_v62 = vld [vmem:[%s2996_s8 + $0x3] ss:$0 sm:$0xff] }
 0x1b4   :  { %v2210_v1 = vld [vmem:[%s2993_s5 + $0x20] sm:$0xff] }
 0x1b5   :  { %v321_v2 = vpop.f32.mrf.mxu1 }
 0x1b6   :  { %v322_v33 = vadd.f32 %v2253_v32, %v321_v2 }
 0x1b7   :  { %389 = vmatpush.bf16.msrb.mxu3 %v2204_v59  ;;  %587 = vmatpush.bf16.msrb.mxu2 %v2211_v63 }
 0x1b8   :  { %v395_v35 = vpack.c.bf16 %v322_v33, %v322_v33 }
 0x1bb   :  { %483 = vmatpush.bf16.msra.mxu3 %v474_v37  ;;  %588 = vmatpush.bf16.msrb.mxu2 %v2210_v1  ;;  %v2259_v37 = vld [vmem:[%s2995_s7 + $0x3] ss:$0 sm:$0xff] }
 0x1bd   :  { %v323_v3 = vpop.f32.mrf.mxu1 }
 0x1be   :  { %v2213_v3 = vld [vmem:[%s2991_s3 + $0x38] sm:$0xff] }
 0x1c2   :  { %1875 = vmatmul.msk.bf16.vlgmr.msrb.gmra.mxu3 %vm92_vm0, %v2497_v38 }
 0x235   :  { %v251_v10 = vpop.f32.mrf.mxu3 }
 0x236   :  { %v252_v11 = vadd.f32 %v251_v10, %v2536_v9 }
 0x238   :  { %v255_v12 = vsel %vm235_vm6, %v252_v11, -inf }
 0x239   :  { %256 = vmax.xlane.f32.xlu1 %v255_v12  ;;  %v2255_v12 = vld [vmem:[%s2994_s6 + $0x2] ss:$0 sm:$0xff] }
 0x23d   :  { %v253_v13 = vpop.f32.mrf.mxu3 }
 0x245   :  { %v391_v15 = vpop.f32.mrf.mxu3 }
 0x246   :  { %v392_v16 = vadd.f32 %v2254_v14, %v391_v15  ;;  %v2215_v14 = vld [vmem:[%s2992_s4 + $0x38] sm:$0xff] }
 0x248   :  { %v428_v17 = vpack.c.bf16 %v392_v16, %v392_v16 }
 0x24a   :  { %v433_v18 = vsel %vm271_vm5, %v428_v17, 0  ;;  %v2214_v17 = vld [vmem:[%s2992_s4 + $0x30] sm:$0xff] }
 0x24b   :  { %442 = vmatpush.bf16.msrb.mxu1 %v433_v18 }
 0x24d   :  { %v393_v19 = vpop.f32.mrf.mxu3 }
 0x24f   :  { %552 = vmatpush.bf16.msra.mxu1 %v2209_v55 }
 0x253   :  { %553 = vmatpush.bf16.msra.mxu1 %v2208_v56 }
 0x2ac   :  { %v257_v20 = vpop.xlane.xlu1 %256 }
 0x2ad   :  { %v258_v21 = vsub.f32 %v252_v11, %v257_v20 }
 0x2af   :  { %v259_v22 = vmul.f32 1.442695, %v258_v21 }
 0x2b1   :  { %2282 = vpow2.f32 %v259_v22  ;;  %v2257_v22 = vld [vmem:[%s2996_s8 + $0x2] ss:$0 sm:$0xff] }
 0x2b7   :  { %v2283_v23 = vpop.eup %2282 }
 0x2b8   :  { %v261_v24 = vsel %vm235_vm6, %v2283_v23, 0.0 }
 0x2b9   :  { %262 = vadd.xlane.f32.xlu1 %v261_v24 }
 0x32c   :  { %v263_v25 = vpop.xlane.xlu1 %262 }
 0x32d   :  { %2284 = vrcp.f32 %v263_v25 }
 0x333   :  { %v2285_v26 = vpop.eup %2284 }
 0x334   :  { %v265_v27 = vmul.f32 %v2285_v26, %v2283_v23  ;;  %v1925_v23 = vld [vmem:[%s2997_s9 + $0x8] sm:$0xf] }
 0x335   :  { %v654_v24 = vsel %vm271_vm5, %v1925_v23, 0 }
 0x336   :  { %v266_v29 = vpack.c.bf16 %v265_v27, %v265_v27 }
 0x338   :  { %1833 = vmatmul.msk.bf16.vlgmr.msra.gmra.mxu0 %vm235_vm6, %v266_v29 }
 0x339   :  { %517 = vmatpush.bf16.msra.mxu0 %v2207_v28 }
 0x33d   :  { %518 = vmatpush.bf16.msra.mxu0 %v2206_v30 }
 0x348   :  { %1876 = vmatmul.msk.bf16.vlgmr.msrb.gmra.mxu0 %vm235_vm6, %v395_v35 }
 0x358   :  { %1894 = vmatmul.msk.bf16.vlgmr.msra.gmra.mxu0 %vm92_vm0, %v2497_v38 }
 0x3b5   :  { %v284_v39 = vpop.f32.mrf.mxu0 }
 0x3b6   :  { %v288_v40 = vpack.c.bf16 %v284_v39, %v284_v39 }
 0x3b8   :  { %1880 = vmatmul.msk.bf16.vlgmr.msra.gmra.mxu3 %vm235_vm6, %v288_v40 }
 0x3bd   :  { %v286_v41 = vpop.f32.mrf.mxu0 }
 0x3c5   :  { %v412_v42 = vpop.f32.mrf.mxu0 }
 0x3c6   :  { %v413_v43 = vadd.f32 %v412_v42, %v2536_v9 }
 0x3c8   :  { %v416_v44 = vsel %vm235_vm6, %v413_v43, -inf }
 0x3c9   :  { %417 = vmax.xlane.f32.xlu2 %v416_v44 }
 0x3cd   :  { %v414_v45 = vpop.f32.mrf.mxu0 }
 0x3d5   :  { %v520_v46 = vpop.f32.mrf.mxu0 }
 0x3d6   :  { %v521_v16 = vadd.f32 %v2255_v12, %v520_v46 }
 0x3d8   :  { %v594_v19 = vpack.c.bf16 %v521_v16, %v521_v16 }
 0x3dd   :  { %v522_v47 = vpop.f32.mrf.mxu0 }
 0x43b   :  { %v2565_v48 = vpop.f32.mrf.mxu3 }
 0x43c   :  { %v418_v49 = vpop.xlane.xlu2 %417 }
 0x43d   :  { %v419_v50 = vsub.f32 %v413_v43, %v418_v49 }
 0x43f   :  { %v420_v51 = vmul.f32 1.442695, %v419_v50 }
 0x441   :  { %2286 = vpow2.f32 %v420_v51  ;;  %v2217_v51 = vld [vmem:[%s2993_s5 + $0x38] sm:$0xff] }
 0x443   :  { %v487_v52 = vpop.f32.mrf.mxu3 }
 0x444   :  { %v2216_v52 = vld [vmem:[%s2993_s5 + $0x30] sm:$0xff] }
 0x447   :  { %v2287_v53 = vpop.eup %2286 }
 0x448   :  { %v422_v54 = vsel %vm235_vm6, %v2287_v53, 0.0 }
 0x449   :  { %423 = vadd.xlane.f32.xlu2 %v422_v54 }
 0x4bc   :  { %v424_v57 = vpop.xlane.xlu2 %423 }
 0x4bd   :  { %2288 = vrcp.f32 %v424_v57 }
 0x4c3   :  { %v2289_v58 = vpop.eup %2288 }
 0x4c4   :  { %v426_v59 = vmul.f32 %v2289_v58, %v2287_v53 }
 0x4c6   :  { %v427_v60 = vpack.c.bf16 %v426_v59, %v426_v59 }
 0x4c8   :  { %1877 = vmatmul.msk.bf16.vlgmr.msrb.gmra.mxu1 %vm235_vm6, %v427_v60  ;;  %v2258_v60 = vld [vmem:[%s2994_s6 + $0x3] ss:$0 sm:$0xff] }
 0x4c9   :  { %663 = vmatpush.bf16.msrb.mxu1 %v654_v24 }
 0x4d8   :  { %1908 = vmatmul.msk.bf16.vlgmr.msra.gmra.mxu1 %vm92_vm0, %v2497_v38 }
 0x545   :  { %v444_v2 = vpop.f32.mrf.mxu1 }
 0x546   :  { %v448_v4 = vpack.c.bf16 %v444_v2, %v444_v2 }
 0x548   :  { %1879 = vmatmul.msk.bf16.vlgmr.msra.gmra.mxu2 %vm235_vm6, %v448_v4 }
 0x549   :  { %698 = vmatpush.bf16.msra.mxu2 %v2213_v3 }
 0x54d   :  { %v446_v6 = vpop.f32.mrf.mxu1  ;;  %699 = vmatpush.bf16.msra.mxu2 %v2212_v5 }
 0x555   :  { %v555_v10 = vpop.f32.mrf.mxu1 }
 0x556   :  { %v556_v11 = vadd.f32 %v2256_v7, %v555_v10 }
 0x558   :  { %v595_v13 = vpack.c.bf16 %v556_v11, %v556_v11  ;;  %1922 = vmatmul.msk.bf16.vlgmr.msrb.gmra.mxu2 %vm92_vm0, %v2497_v38 }
 0x55a   :  { %v600_v15 = vsel %vm235_vm6, %v595_v13, 0 }
 0x55b   :  { %609 = vmatpush.bf16.xpose.msrb.mxu3 %v600_v15  ;;  %v2655_v15 = vld [vmem:[%s3009_s26 + $0x8] sm:$0xff] }
 0x55c   :  { %v996_v16 = vsel %vm92_vm0, %v2655_v15, 0.0 }
 0x55d   :  { %v557_v18 = vpop.f32.mrf.mxu1 }
 0x562   :  { %1923 = vmatmul.msk.bf16.vlgmr.msrb.gmra.mxu3 %vm235_vm6, %v594_v19 }
 0x563   :  { %733 = vmatpush.bf16.msra.mxu3 %v2215_v14 }
 0x567   :  { %734 = vmatpush.bf16.msra.mxu3 %v2214_v17 }
 0x568   :  { %1940 = vmatmul.msk.bf16.vlgmr.msra.gmra.mxu2 %vm92_vm0, %v2497_v38 }
 0x572   :  { %1954 = vmatmul.msk.bf16.vlgmr.msra.gmra.mxu3 %vm92_vm0, %v2497_v38 }
 0x5cb   :  { %v466_v20 = vpop.f32.mrf.mxu2 }
 0x5cc   :  { %v486_v5 = vadd.f32 %v2565_v48, %v466_v20 }
 0x5d3   :  { %v468_v21 = vpop.f32.mrf.mxu2 }
 0x5db   :  { %v590_v25 = vpop.f32.mrf.mxu2 }
 0x5dc   :  { %v591_v26 = vadd.f32 %v2257_v22, %v590_v25 }
 0x5de   :  { %v627_v27 = vpack.c.bf16 %v591_v26, %v591_v26 }
 0x5e0   :  { %v632_v28 = vsel %vm271_vm5, %v627_v27, 0 }
 0x5e1   :  { %641 = vmatpush.bf16.msrb.mxu0 %v632_v28 }
 0x5e3   :  { %v592_v29 = vpop.f32.mrf.mxu2 }
 0x5e5   :  { %v611_v30 = vpop.f32.mrf.mxu3  ;;  %768 = vmatpush.bf16.msra.mxu0 %v2217_v51 }
 0x5e6   :  { %v612_v32 = vadd.f32 %v611_v30, %v2536_v9  ;;  %v1971_v30 = vld [vmem:[%s2997_s9 + $0xc] sm:$0xf] }
 0x5e8   :  { %v615_v33 = vsel %vm235_vm6, %v612_v32, -inf }
 0x5e9   :  { %616 = vmax.xlane.f32.xlu0 %v615_v33  ;;  %769 = vmatpush.bf16.msra.mxu0 %v2216_v52 }
 0x5eb   :  { %v701_v35 = vpop.f32.mrf.mxu2 }
 0x5ec   :  { %v702_v61 = vadd.f32 %v2258_v60, %v701_v35 }
 0x5ed   :  { %v613_v36 = vpop.f32.mrf.mxu3 }
 0x5ee   :  { %v775_v1 = vpack.c.bf16 %v702_v61, %v702_v61 }
 0x5f3   :  { %v703_v39 = vpop.f32.mrf.mxu2 }
 0x5f5   :  { %v736_v40 = vpop.f32.mrf.mxu3 }
 0x5f6   :  { %v737_v41 = vadd.f32 %v2259_v37, %v736_v40 }
 0x5f8   :  { %v776_v42 = vpack.c.bf16 %v737_v41, %v737_v41 }
 0x5fa   :  { %v781_v43 = vsel %vm235_vm6, %v776_v42, 0 }
 0x5fb   :  { %790 = vmatpush.bf16.xpose.msra.mxu1 %v781_v43 }
 0x5fd   :  { %v738_v44 = vpop.f32.mrf.mxu3 }
 0x65c   :  { %v617_v45 = vpop.xlane.xlu0 %616 }
 0x65d   :  { %v618_v46 = vsub.f32 %v612_v32, %v617_v45  ;;  %v835_v32 = vsel %vm271_vm5, %v1971_v30, 0  ;;  %v2219_v45 = vld [vmem:[%s2991_s3 + $0x8] sm:$0xff] }
 0x65e   :  { %844 = vmatpush.bf16.msrb.mxu3 %v835_v32 }
 0x65f   :  { %v619_v47 = vmul.f32 1.442695, %v618_v46  ;;  %v2221_v46 = vld [vmem:[%s2992_s4 + $0x8] sm:$0xff] }
 0x661   :  { %2290 = vpow2.f32 %v619_v47 }
 0x662   :  { %1083 = vmatpush.bf16.msra.mxu3 %v2221_v46 }
 0x667   :  { %v2291_v49 = vpop.eup %2290 }
 0x668   :  { %v621_v50 = vsel %vm235_vm6, %v2291_v49, 0.0 }
 0x669   :  { %622 = vadd.xlane.f32.xlu1 %v621_v50  ;;  %v2220_v50 = vld [vmem:[%s2992_s4] sm:$0xff] }
 0x66a   :  { %1084 = vmatpush.bf16.msra.mxu3 %v2220_v50 }
 0x671   :  { %997 = vadd.xlane.f32.xlu1 %v996_v16 }
 0x6dc   :  { %v623_v53 = vpop.xlane.xlu1 %622 }
 0x6dd   :  { %2292 = vrcp.f32 %v623_v53 }
 0x6e3   :  { %v2293_v54 = vpop.eup %2292 }
 0x6e4   :  { %v625_v55 = vmul.f32 %v2293_v54, %v2291_v49  ;;  %v998_v21 = vpop.xlane.xlu1 %997  ;;  %v2218_v49 = vld [vmem:[%s2991_s3] sm:$0xff] }
 0x6e5   :  { %v999_v22 = vmul.f32 %v998_v21, %v2452_v8 }
 0x6e6   :  { %v626_v56 = vpack.c.bf16 %v625_v55, %v625_v55 }
 0x6e7   :  { %v1000_v23 = vsub.f32 %v2655_v15, %v999_v22 }
 0x6e8   :  { %1924 = vmatmul.msk.bf16.vlgmr.msrb.gmra.mxu0 %vm235_vm6, %v626_v56 }
 0x6e9   :  { %v1001_v24 = vmul.f32 %v1000_v23, %v1000_v23 }
 0x6eb   :  { %v1002_v25 = vsel %vm92_vm0, %v1001_v24, 0.0  ;;  %v2732_v24 = vld [vmem:[%s3001_s13] sm:$0xff] }
 0x6f8   :  { %1968 = vmatmul.msk.bf16.vlgmr.msra.gmra.mxu0 %vm92_vm0, %v2497_v38 }
 0x765   :  { %v643_v57 = vpop.f32.mrf.mxu0 }
 0x766   :  { %v647_v58 = vpack.c.bf16 %v643_v57, %v643_v57 }
 0x768   :  { %1926 = vmatmul.msk.bf16.vlgmr.msrb.gmra.mxu1 %vm235_vm6, %v647_v58 }
 0x76d   :  { %v645_v59 = vpop.f32.mrf.mxu0 }
 0x76e   :  { %v2694_v59 = vld [vmem:[%s2998_s10] ss:$0 sm:$0xff] }
 0x775   :  { %v771_v63 = vpop.f32.mrf.mxu0 }
 0x776   :  { %v772_v2 = vadd.f32 %v2260_v62, %v771_v63 }
 0x778   :  { %v808_v3 = vpack.c.bf16 %v772_v2, %v772_v2  ;;  %1969 = vmatmul.msk.bf16.vlgmr.msra.gmra.mxu1 %vm235_vm6, %v775_v1  ;;  %v2263_v1 = vld [vmem:[%s2995_s7] ss:$0 sm:$0xff] }
 0x77a   :  { %v813_v38 = vsel %vm271_vm5, %v808_v3, 0 }
 0x77b   :  { %822 = vmatpush.bf16.msrb.mxu2 %v813_v38  ;;  %v2262_v38 = vld [vmem:[%s2994_s6] ss:$0 sm:$0xff] }
 0x77d   :  { %v773_v4 = vpop.f32.mrf.mxu0 }
 0x77f   :  { %1050 = vmatpush.bf16.msra.mxu2 %v2219_v45  ;;  %v2225_v45 = vld [vmem:[%s2991_s3 + $0x18] sm:$0xff] }
 0x783   :  { %1051 = vmatpush.bf16.msra.mxu2 %v2218_v49  ;;  %v2224_v49 = vld [vmem:[%s2991_s3 + $0x10] sm:$0xff] }
 0x7e5   :  { %v665_v6 = vpop.f32.mrf.mxu1 }
 0x7e6   :  { %v2648_v7 = vadd.f32 %v665_v6, %v486_v5 }
 0x7ed   :  { %v667_v10 = vpop.f32.mrf.mxu1 }
 0x7f5   :  { %v792_v11 = vpop.f32.mrf.mxu1 }
 0x7f6   :  { %v793_v12 = vadd.f32 %v792_v11, %v2536_v9 }
 0x7f8   :  { %v796_v13 = vsel %vm235_vm6, %v793_v12, -inf }
 0x7f9   :  { %797 = vmax.xlane.f32.xlu2 %v796_v13 }
 0x7fd   :  { %v794_v14 = vpop.f32.mrf.mxu1 }
 0x801   :  { %1003 = vadd.xlane.f32.xlu2 %v1002_v25 }
 0x86c   :  { %v798_v48 = vpop.xlane.xlu2 %797 }
 0x86d   :  { %v799_v17 = vsub.f32 %v793_v12, %v798_v48 }
 0x86f   :  { %v800_v18 = vmul.f32 1.442695, %v799_v17 }
 0x871   :  { %2294 = vpow2.f32 %v800_v18 }
 0x874   :  { %v1004_v33 = vpop.xlane.xlu2 %1003 }
 0x875   :  { %v1005_v35 = vmul.f32 %v1004_v33, %v2452_v8 }
 0x877   :  { %v2295_v19 = vpop.eup %2294  ;;  %v1006_v36 = vadd.f32 1e-05, %v1005_v35 }
 0x878   :  { %v802_v20 = vsel %vm235_vm6, %v2295_v19, 0.0 }
 0x879   :  { %803 = vadd.xlane.f32.xlu0 %v802_v20  ;;  %vm1013_vm8 = vweird.f32 %v1006_v36 }
 0x8ec   :  { %v804_v26 = vpop.xlane.xlu0 %803 }
 0x8ed   :  { %2296 = vrcp.f32 %v804_v26 }
 0x8ee   :  { %2298 = vrsqrt.f32 %v1006_v36 }
 0x8f3   :  { %v2297_v27 = vpop.eup %2296 }
 0x8f4   :  { %v806_v28 = vmul.f32 %v2297_v27, %v2295_v19  ;;  %v2299_v37 = vpop.eup %2298 }
 0x8f5   :  { %v1008_v39 = vmul.f32 %v2299_v37, %v1006_v36  ;;  %vm1014_vm9 = vweird.f32 %v2299_v37 }
 0x8f6   :  { %v807_v29 = vpack.c.bf16 %v806_v28, %v806_v28  ;;  %vm1015_vm10 = vmor %vm1013_vm8, %vm1014_vm9  ;;  %v2223_v28 = vld [vmem:[%s2993_s5 + $0x8] sm:$0xff] }
 0x8f7   :  { %v1009_v40 = vmul.f32 %v2299_v37, %v1008_v39  ;;  %v2745_v39 = vld [vmem:[%s2999_s11] ss:$0 sm:$0xff] }
 0x8f8   :  { %1970 = vmatmul.msk.bf16.vlgmr.msrb.gmra.mxu2 %vm235_vm6, %v807_v29  ;;  %v2222_v29 = vld [vmem:[%s2993_s5] sm:$0xff] }
 0x8f9   :  { %v1010_v41 = vmul.f32 0.5, %v1009_v40 }
 0x8fb   :  { %v1011_v42 = vsub.f32 1.5, %v1010_v41 }
 0x8fd   :  { %v1012_v43 = vmul.f32 %v2299_v37, %v1011_v42  ;;  %v2750_v42 = vld [vmem:[%s3000_s12] ss:$0 sm:$0xff] }
 0x8ff   :  { %v1016_v44 = vsel %vm1015_vm10, %v2299_v37, %v1012_v43 }
 0x900   :  { %v1017_v47 = vmul.f32 %v1016_v44, %v1000_v23  ;;  %v2726_v23 = vld [vmem:[%s3001_s13 + $0x8] sm:$0xff] }
 0x901   :  { %911 = vmatpush.bf16.msrb.mxu0 %v2726_v23 }
 0x902   :  { %v1018_v51 = vmul.f32 %v2485_v31, %v1017_v47  ;;  %v2761_v47 = vld [vmem:[%s3003_s15 + $0x38] sm:$0xff] }
 0x903   :  { %979 = vmatpush.bf16.msrb.mxu1 %v2761_v47 }
 0x904   :  { %v1019_v52 = vadd.f32 %v2490_v34, %v1018_v51  ;;  %v2770_v51 = vld [vmem:[%s3003_s15 + $0x30] sm:$0xff] }
 0x905   :  { %912 = vmatpush.bf16.msrb.mxu0 %v2732_v24 }
 0x906   :  { %v2683_v53 = vpack.c.bf16 %v1019_v52, %v1019_v52 }
 0x907   :  { %980 = vmatpush.bf16.msrb.mxu1 %v2770_v51 }
 0x908   :  { %2023 = vmatmul.msk.bf16.vlgmr.msra.gmra.mxu2 %vm92_vm0, %v2683_v53 }
 0x909   :  { %1116 = vmatpush.bf16.msra.mxu0 %v2223_v28 }
 0x90d   :  { %1117 = vmatpush.bf16.msra.mxu0 %v2222_v29 }
 0x97b   :  { %v824_v54 = vpop.f32.mrf.mxu2 }
 0x97c   :  { %v828_v55 = vpack.c.bf16 %v824_v54, %v824_v54  ;;  %v2264_v54 = vld [vmem:[%s2996_s8 + $0x1] ss:$0 sm:$0xff] }
 0x97e   :  { %1972 = vmatmul.msk.bf16.vlgmr.msrb.gmra.mxu3 %vm235_vm6, %v828_v55 }
 0x983   :  { %v826_v56 = vpop.f32.mrf.mxu2 }
 0x98b   :  { %v1053_v57 = vpop.f32.mrf.mxu2 }
 0x98c   :  { %v1054_v6 = vadd.f32 %v2262_v38, %v1053_v57  ;;  %v2821_v38 = vld [vmem:[%s3002_s14] ss:$0 sm:$0xff] }
 0x98e   :  { %2032 = vmatmul.msk.bf16.vlgmr.msra.gmra.mxu3 %vm92_vm0, %v2683_v53  ;;  %v1123_v11 = vpack.c.bf16 %v1054_v6, %v1054_v6 }
 0x993   :  { %v1055_v58 = vpop.f32.mrf.mxu2 }
 0xa01   :  { %v846_v31 = vpop.f32.mrf.mxu3 }
 0xa02   :  { %v850_v34 = vadd.f32 %v846_v31, %v2648_v7  ;;  %v2228_v7 = vld [vmem:[%s2993_s5 + $0x10] sm:$0xff] }
 0xa04   :  { %v851_v60 = vadd.f32 %v850_v34, %v2448_v0  ;;  %v2229_v0 = vld [vmem:[%s2993_s5 + $0x18] sm:$0xff] }
 0xa06   :  { %v2698_v61 = vadd.f32 %v2694_v59, %v851_v60  ;;  %v2785_v60 = vld [vmem:[%s3003_s15 + $0x28] sm:$0xff] }
 0xa07   :  { %981 = vmatpush.bf16.msrb.mxu1 %v2785_v60 }
 0xa08   :  { %v856_v62 = vsel %vm92_vm0, %v2698_v61, 0.0 }
 0xa09   :  { %857 = vadd.xlane.f32.xlu0 %v856_v62  ;;  %v848_v63 = vpop.f32.mrf.mxu3  ;;  %v2791_v62 = vld [vmem:[%s3003_s15 + $0x20] sm:$0xff] }
 0xa0a   :  { %v2797_v63 = vld [vmem:[%s3003_s15 + $0x18] sm:$0xff] }
 0xa0b   :  { %982 = vmatpush.bf16.msrb.mxu1 %v2791_v62 }
 0xa0f   :  { %983 = vmatpush.bf16.msrb.mxu1 %v2797_v63 }
 0xa11   :  { %v1086_v2 = vpop.f32.mrf.mxu3 }
 0xa12   :  { %v1087_v3 = vadd.f32 %v2263_v1, %v1086_v2  ;;  %v2803_v1 = vld [vmem:[%s3003_s15 + $0x10] sm:$0xff]  ;;  %v2809_v2 = vld [vmem:[%s3003_s15 + $0x8] sm:$0xff] }
 0xa13   :  { %984 = vmatpush.bf16.msrb.mxu1 %v2803_v1 }
 0xa14   :  { %v1124_v4 = vpack.c.bf16 %v1087_v3, %v1087_v3  ;;  %v2815_v3 = vld [vmem:[%s3003_s15] sm:$0xff] }
 0xa16   :  { %v1129_v5 = vsel %vm235_vm6, %v1124_v4, 0 }
 0xa17   :  { %1138 = vmatpush.bf16.xpose.msrb.mxu2 %v1129_v5  ;;  %985 = vmatpush.bf16.msrb.mxu1 %v2809_v2  ;;  %v2227_v5 = vld [vmem:[%s2992_s4 + $0x18] sm:$0xff] }
 0xa19   :  { %v1088_v10 = vpop.f32.mrf.mxu3 }
 0xa1b   :  { %986 = vmatpush.bf16.msrb.mxu1 %v2815_v3 }
 0xa1e   :  { %2042 = vmatmul.msk.bf16.vlgmr.msrb.gmra.mxu2 %vm235_vm6, %v1123_v11 }
 0xa1f   :  { %1270 = vmatpush.bf16.msra.mxu2 %v2229_v0  ;;  %1237 = vmatpush.bf16.msra.mxu1 %v2227_v5 }
 0xa23   :  { %1271 = vmatpush.bf16.msra.mxu2 %v2228_v7  ;;  %v2226_v7 = vld [vmem:[%s2992_s4 + $0x10] sm:$0xff] }
 0xa24   :  { %1238 = vmatpush.bf16.msra.mxu1 %v2226_v7 }
 0xa2e   :  { %2085 = vmatmul.msk.bf16.vlgmr.msra.gmra.mxu2 %vm92_vm0, %v2683_v53 }
 0xa7c   :  { %v858_v12 = vpop.xlane.xlu0 %857 }
 0xa7d   :  { %v859_v13 = vmul.f32 %v858_v12, %v2452_v8 }
 0xa7f   :  { %v860_v14 = vsub.f32 %v2698_v61, %v859_v13 }
 0xa81   :  { %v861_v16 = vmul.f32 %v860_v14, %v860_v14 }
 0xa83   :  { %v862_v48 = vsel %vm92_vm0, %v861_v16, 0.0 }
 0xa84   :  { %863 = vadd.xlane.f32.xlu1 %v862_v48  ;;  %v2268_v48 = vld [vmem:[%s2996_s8] ss:$0 sm:$0xff] }
 0xaa1   :  { %v1140_v17 = vpop.f32.mrf.mxu2 }
 0xaa2   :  { %v1141_v18 = vadd.f32 %v1140_v17, %v2536_v9 }
 0xaa4   :  { %v1144_v19 = vsel %vm235_vm6, %v1141_v18, -inf }
 0xaa5   :  { %1145 = vmax.xlane.f32.xlu2 %v1144_v19 }
 0xaa9   :  { %v1142_v20 = vpop.f32.mrf.mxu2 }
 0xab1   :  { %v1273_v21 = vpop.f32.mrf.mxu2 }
 0xab2   :  { %v1274_v56 = vadd.f32 %v2264_v54, %v1273_v21 }
 0xab4   :  { %v1310_v57 = vpack.c.bf16 %v1274_v56, %v1274_v56  ;;  %v2269_v56 = vld [vmem:[%s2994_s6 + $0x1] ss:$0 sm:$0xff] }
 0xab6   :  { %v1315_v34 = vsel %vm271_vm5, %v1310_v57, 0 }
 0xab9   :  { %v1275_v22 = vpop.f32.mrf.mxu2 }
 0xaf7   :  { %v864_v25 = vpop.xlane.xlu1 %863 }
 0xaf8   :  { %v865_v26 = vmul.f32 %v864_v25, %v2452_v8 }
 0xafa   :  { %v866_v27 = vadd.f32 1e-05, %v865_v26 }
 0xafc   :  { %2300 = vrsqrt.f32 %v866_v27  ;;  %vm873_vm12 = vweird.f32 %v866_v27 }
 0xb02   :  { %v2301_v30 = vpop.eup %2300 }
 0xb03   :  { %v868_v32 = vmul.f32 %v2301_v30, %v866_v27  ;;  %vm874_vm11 = vweird.f32 %v2301_v30 }
 0xb04   :  { %vm875_vm13 = vmor %vm873_vm12, %vm874_vm11 }
 0xb05   :  { %v869_v33 = vmul.f32 %v2301_v30, %v868_v32 }
 0xb07   :  { %v870_v35 = vmul.f32 0.5, %v869_v33 }
 0xb09   :  { %v871_v36 = vsub.f32 1.5, %v870_v35 }
 0xb0b   :  { %v872_v37 = vmul.f32 %v2301_v30, %v871_v36  ;;  %v1177_v36 = vld [vmem:[%s2997_s9] sm:$0xf] }
 0xb0d   :  { %v876_v40 = vsel %vm875_vm13, %v2301_v30, %v872_v37  ;;  %v1355_v37 = vsel %vm271_vm5, %v1177_v36, 0 }
 0xb0e   :  { %v877_v41 = vmul.f32 %v876_v40, %v860_v14  ;;  %1364 = vmatpush.bf16.msrb.mxu2 %v1355_v37  ;;  %v2844_v40 = vld [vmem:[%s3004_s16] ss:$0 sm:$0xff]  ;;  %v2236_v37 = vld [vmem:[%s2991_s3 + $0x30] sm:$0xff] }
 0xb10   :  { %v881_v43 = vmul.f32 %v2745_v39, %v877_v41 }
 0xb12   :  { %v885_v44 = vadd.f32 %v2750_v42, %v881_v43 }
 0xb14   :  { %v886_v46 = vpack.c.bf16 %v885_v44, %v885_v44 }
 0xb16   :  { %1981 = vmatmul.msk.bf16.vlgmr.msrb.gmra.mxu0 %vm92_vm0, %v886_v46 }
 0xb17   :  { %1204 = vmatpush.bf16.msrb.mxu0 %v2225_v45 }
 0xb18   :  { %v1146_v50 = vpop.xlane.xlu2 %1145 }
 0xb19   :  { %v1147_v52 = vsub.f32 %v1141_v18, %v1146_v50 }
 0xb1b   :  { %v1148_v55 = vmul.f32 1.442695, %v1147_v52  ;;  %1205 = vmatpush.bf16.msrb.mxu0 %v2224_v49  ;;  %v2271_v52 = vld [vmem:[%s2995_s7 + $0x1] ss:$0 sm:$0xff] }
 0xb1d   :  { %2302 = vpow2.f32 %v1148_v55 }
 0xb23   :  { %v2303_v58 = vpop.eup %2302 }
 0xb24   :  { %v1150_v31 = vsel %vm235_vm6, %v2303_v58, 0.0 }
 0xb25   :  { %1151 = vadd.xlane.f32.xlu0 %v1150_v31 }
 0xb26   :  { %2041 = vmatmul.msk.bf16.vlgmr.msra.gmra.mxu0 %vm92_vm0, %v2683_v53 }
 0xb27   :  { %1324 = vmatpush.bf16.msra.mxu0 %v1315_v34  ;;  %v2230_v34 = vld [vmem:[%s2991_s3 + $0x20] sm:$0xff] }
 0xb36   :  { %2057 = vmatmul.msk.bf16.vlgmr.msrb.gmra.mxu0 %vm92_vm0, %v2683_v53 }
 0xb93   :  { %v914_v4 = vpop.f32.mrf.mxu0 }
 0xb94   :  { %v915_v0 = vadd.f32 %v2821_v38, %v914_v4 }
 0xb96   :  { %v919_v6 = vmul.f32 0.044715, %v915_v0  ;;  %v918_v25 = vmul.f32 0.5, %v915_v0 }
 0xb98   :  { %v920_v10 = vmul.f32 %v919_v6, %v915_v0  ;;  %v1152_v12 = vpop.xlane.xlu0 %1151 }
 0xb99   :  { %2304 = vrcp.f32 %v1152_v12 }
 0xb9a   :  { %v921_v11 = vmul.f32 %v920_v10, %v915_v0 }
 0xb9b   :  { %v916_v13 = vpop.f32.mrf.mxu0 }
 0xb9c   :  { %v922_v14 = vadd.f32 %v921_v11, %v915_v0 }
 0xb9e   :  { %v923_v16 = vmul.f32 0.7978846, %v922_v14 }
 0xb9f   :  { %v2305_v17 = vpop.eup %2304 }
 0xba0   :  { %2306 = vtanh.f32 %v923_v16  ;;  %v1154_v21 = vmul.f32 %v2305_v17, %v2303_v58 }
 0xba2   :  { %v1155_v29 = vpack.c.bf16 %v1154_v21, %v1154_v21  ;;  %v2232_v21 = vld [vmem:[%s2992_s4 + $0x20] sm:$0xff] }
 0xba3   :  { %v1119_v18 = vpop.f32.mrf.mxu0 }
 0xba4   :  { %v1120_v19 = vadd.f32 %v2268_v48, %v1119_v18 }
 0xba6   :  { %v2307_v20 = vpop.eup %2306  ;;  %v1156_v22 = vpack.c.bf16 %v1120_v19, %v1120_v19 }
 0xba7   :  { %v925_v26 = vadd.f32 1.0, %v2307_v20  ;;  %v2233_v20 = vld [vmem:[%s2992_s4 + $0x28] sm:$0xff] }
 0xba8   :  { %v1161_v27 = vsel %vm271_vm5, %v1156_v22, 0  ;;  %1429 = vmatpush.bf16.msrb.mxu0 %v2233_v20 }
 0xba9   :  { %1170 = vmatpush.bf16.msrb.mxu3 %v1161_v27  ;;  %v926_v28 = vmul.f32 %v925_v26, %v918_v25 }
 0xbab   :  { %v1121_v30 = vpop.f32.mrf.mxu0  ;;  %v927_v32 = vpack.c.bf16 %v926_v28, %v926_v28  ;;  %v2088_v28 = vld [vmem:[%s2997_s9 + $0x4] sm:$0xf] }
 0xbac   :  { %2043 = vmatmul.msk.bf16.vlgmr.msrb.gmra.mxu3 %vm235_vm6, %v1155_v29  ;;  %1430 = vmatpush.bf16.msrb.mxu0 %v2232_v21  ;;  %v1336_v29 = vsel %vm271_vm5, %v2088_v28, 0  ;;  %v2235_v30 = vld [vmem:[%s2993_s5 + $0x28] sm:$0xff] }
 0xbad   :  { %987 = vmatmul.bf16.vlgmr.msrb.gmra.mxu1 %v927_v32  ;;  %v2234_v32 = vld [vmem:[%s2993_s5 + $0x20] sm:$0xff] }
 0xbae   :  { %1345 = vmatpush.bf16.msrb.mxu1 %v1336_v29 }
 0xbb3   :  { %v1207_v33 = vpop.f32.mrf.mxu0 }
 0xbb4   :  { %v1208_v31 = vadd.f32 %v2269_v56, %v1207_v33 }
 0xbb6   :  { %v1277_v0 = vpack.c.bf16 %v1208_v31, %v1208_v31  ;;  %v2274_v31 = vld [vmem:[%s2996_s8 + $0x2] ss:$0 sm:$0xff] }
 0xbbb   :  { %v1209_v35 = vpop.f32.mrf.mxu0 }
 0xbbc   :  { %v2237_v35 = vld [vmem:[%s2991_s3 + $0x38] sm:$0xff] }
 0xbbd   :  { %2071 = vmatmul.msk.bf16.vlgmr.msra.gmra.mxu1 %vm92_vm0, %v2683_v53 }
 0xbbe   :  { %1462 = vmatpush.bf16.msra.mxu1 %v2235_v30 }
 0xbc2   :  { %1463 = vmatpush.bf16.msra.mxu1 %v2234_v32  ;;  %v2241_v32 = vld [vmem:[%s2993_s5 + $0x38] sm:$0xff] }
 0xc2a   :  { %v988_v41 = vpop.f32.mrf.mxu1 }
 0xc2b   :  { %v989_v43 = vadd.f32 %v2844_v40, %v988_v41 }
 0xc2d   :  { %v992_v44 = vadd.f32 %v989_v43, %v2698_v61  ;;  %v2231_v61 = vld [vmem:[%s2991_s3 + $0x28] sm:$0xff]  ;;  %v2273_v43 = vld [vmem:[%s2995_s7 + $0x2] ss:$0 sm:$0xff] }
 0xc2f   :  { %993 = vst.msk [vmem:[#allocation2] sm:$0xff] %vm92_vm0, %v992_v44  ;;  %v1172_v45 = vpop.f32.mrf.mxu3 }
 0xc30   :  { %v1176_v46 = vpack.c.bf16 %v1172_v45, %v1172_v45 }
 0xc32   :  { %v990_v49 = vpop.f32.mrf.mxu1  ;;  %2090 = vmatmul.msk.bf16.vlgmr.msrb.gmra.mxu2 %vm235_vm6, %v1176_v46  ;;  %v2272_v46 = vld [vmem:[%s2994_s6 + $0x2] ss:$0 sm:$0xff] }
 0xc37   :  { %v1174_v50 = vpop.f32.mrf.mxu3 }
 0xc38   :  { %v2239_v50 = vld [vmem:[%s2992_s4 + $0x38] sm:$0xff] }
 0xc3a   :  { %v1240_v54 = vpop.f32.mrf.mxu1 }
 0xc3b   :  { %v1241_v55 = vadd.f32 %v2271_v52, %v1240_v54 }
 0xc3d   :  { %v1278_v57 = vpack.c.bf16 %v1241_v55, %v1241_v55  ;;  %v2238_v55 = vld [vmem:[%s2992_s4 + $0x30] sm:$0xff] }
 0xc3f   :  { %v1283_v58 = vsel %vm235_vm6, %v1278_v57, 0 }
 0xc40   :  { %1292 = vmatpush.bf16.xpose.msra.mxu3 %v1283_v58 }
 0xc42   :  { %v1242_v4 = vpop.f32.mrf.mxu1 }
 0xc47   :  { %2086 = vmatmul.msk.bf16.vlgmr.msra.gmra.mxu3 %vm235_vm6, %v1277_v0 }
 0xc48   :  { %1396 = vmatpush.bf16.msrb.mxu3 %v2231_v61 }
 0xc4c   :  { %1397 = vmatpush.bf16.msrb.mxu3 %v2230_v34 }
 0xc57   :  { %2104 = vmatmul.msk.bf16.vlgmr.msrb.gmra.mxu3 %vm92_vm0, %v2683_v53 }
 0xcb5   :  { %v2866_v5 = vpop.f32.mrf.mxu2 }
 0xcbd   :  { %v1368_v6 = vpop.f32.mrf.mxu2 }
 0xcbe   :  { %v2135_v6 = vld [vmem:[%s2997_s9 + $0x8] sm:$0xf] }
 0xcca   :  { %v1294_v7 = vpop.f32.mrf.mxu3 }
 0xccb   :  { %v1295_v10 = vadd.f32 %v1294_v7, %v2536_v9 }
 0xccd   :  { %v1298_v11 = vsel %vm235_vm6, %v1295_v10, -inf }
 0xcce   :  { %1299 = vmax.xlane.f32.xlu1 %v1298_v11 }
 0xcd2   :  { %v1296_v12 = vpop.f32.mrf.mxu3 }
 0xcda   :  { %v1399_v13 = vpop.f32.mrf.mxu3 }
 0xcdb   :  { %v1400_v54 = vadd.f32 %v2272_v46, %v1399_v13  ;;  %v2275_v46 = vld [vmem:[%s2994_s6 + $0x3] ss:$0 sm:$0xff] }
 0xcdd   :  { %v1469_v57 = vpack.c.bf16 %v1400_v54, %v1400_v54 }
 0xce2   :  { %v1401_v14 = vpop.f32.mrf.mxu3 }
 0xd41   :  { %v1300_v16 = vpop.xlane.xlu1 %1299 }
 0xd42   :  { %v1301_v48 = vsub.f32 %v1295_v10, %v1300_v16  ;;  %v1528_v10 = vsel %vm271_vm5, %v2135_v6, 0 }
 0xd44   :  { %v1302_v17 = vmul.f32 1.442695, %v1301_v48 }
 0xd46   :  { %2308 = vpow2.f32 %v1302_v17 }
 0xd4c   :  { %v2309_v18 = vpop.eup %2308 }
 0xd4d   :  { %v1304_v19 = vsel %vm235_vm6, %v2309_v18, 0.0 }
 0xd4e   :  { %1305 = vadd.xlane.f32.xlu2 %v1304_v19 }
 0xdc1   :  { %v1306_v22 = vpop.xlane.xlu2 %1305 }
 0xdc2   :  { %2310 = vrcp.f32 %v1306_v22 }
 0xdc8   :  { %v2311_v25 = vpop.eup %2310 }
 0xdc9   :  { %v1308_v26 = vmul.f32 %v2311_v25, %v2309_v18  ;;  %v2276_v18 = vld [vmem:[%s2995_s7 + $0x3] ss:$0 sm:$0xff] }
 0xdcb   :  { %v1309_v27 = vpack.c.bf16 %v1308_v26, %v1308_v26 }
 0xdcd   :  { %2087 = vmatmul.msk.bf16.vlgmr.msra.gmra.mxu0 %vm235_vm6, %v1309_v27 }
 0xdce   :  { %1537 = vmatpush.bf16.msra.mxu0 %v1528_v10 }
 0xddd   :  { %2118 = vmatmul.msk.bf16.vlgmr.msrb.gmra.mxu0 %vm92_vm0, %v2683_v53 }
 0xe4a   :  { %v1326_v33 = vpop.f32.mrf.mxu0 }
 0xe4b   :  { %v1330_v36 = vpack.c.bf16 %v1326_v33, %v1326_v33  ;;  %v2240_v33 = vld [vmem:[%s2993_s5 + $0x30] sm:$0xff] }
 0xe4d   :  { %2089 = vmatmul.msk.bf16.vlgmr.msrb.gmra.mxu1 %vm235_vm6, %v1330_v36 }
 0xe4e   :  { %1570 = vmatpush.bf16.msrb.mxu1 %v2237_v35 }
 0xe52   :  { %v1328_v41 = vpop.f32.mrf.mxu0  ;;  %1571 = vmatpush.bf16.msrb.mxu1 %v2236_v37 }
 0xe5a   :  { %v1432_v44 = vpop.f32.mrf.mxu0 }
 0xe5b   :  { %v1433_v45 = vadd.f32 %v2273_v43, %v1432_v44 }
 0xe5d   :  { %v1470_v49 = vpack.c.bf16 %v1433_v45, %v1433_v45  ;;  %2132 = vmatmul.msk.bf16.vlgmr.msra.gmra.mxu1 %vm92_vm0, %v2683_v53 }
 0xe5f   :  { %v1475_v52 = vsel %vm235_vm6, %v1470_v49, 0 }
 0xe60   :  { %1484 = vmatpush.bf16.xpose.msra.mxu2 %v1475_v52 }
 0xe62   :  { %v1434_v56 = vpop.f32.mrf.mxu0 }
 0xe67   :  { %2133 = vmatmul.msk.bf16.vlgmr.msra.gmra.mxu2 %vm235_vm6, %v1469_v57 }
 0xe68   :  { %1603 = vmatpush.bf16.msrb.mxu2 %v2239_v50 }
 0xe6c   :  { %1604 = vmatpush.bf16.msrb.mxu2 %v2238_v55 }
 0xe6d   :  { %2150 = vmatmul.msk.bf16.vlgmr.msrb.gmra.mxu1 %vm92_vm0, %v2683_v53 }
 0xe77   :  { %2164 = vmatmul.msk.bf16.vlgmr.msrb.gmra.mxu2 %vm92_vm0, %v2683_v53 }
 0xeca   :  { %v2917_v61 = vpop.f32.mrf.mxu1 }
 0xed2   :  { %v1349_v58 = vpop.f32.mrf.mxu1 }
 0xeda   :  { %v1465_v34 = vpop.f32.mrf.mxu1 }
 0xedb   :  { %v1466_v4 = vadd.f32 %v2274_v31, %v1465_v34 }
 0xedd   :  { %v1502_v0 = vpack.c.bf16 %v1466_v4, %v1466_v4 }
 0xedf   :  { %v1507_v7 = vsel %vm271_vm5, %v1502_v0, 0 }
 0xee0   :  { %1516 = vmatpush.bf16.msra.mxu3 %v1507_v7 }
 0xee2   :  { %v1467_v11 = vpop.f32.mrf.mxu1 }
 0xee4   :  { %1636 = vmatpush.bf16.msrb.mxu3 %v2241_v32 }
 0xee8   :  { %1637 = vmatpush.bf16.msrb.mxu3 %v2240_v33 }
 0xeea   :  { %v1486_v12 = vpop.f32.mrf.mxu2  ;;  %v1573_v13 = vpop.f32.mrf.mxu1 }
 0xeeb   :  { %v1487_v14 = vadd.f32 %v1486_v12, %v2536_v9 }
 0xeed   :  { %v1490_v16 = vsel %vm235_vm6, %v1487_v14, -inf }
 0xeee   :  { %1491 = vmax.xlane.f32.xlu0 %v1490_v16 }
 0xef2   :  { %v1488_v48 = vpop.f32.mrf.mxu2  ;;  %v1575_v17 = vpop.f32.mrf.mxu1 }
 0xefa   :  { %v1606_v19 = vpop.f32.mrf.mxu2 }
 0xefb   :  { %v1607_v20 = vadd.f32 %v2276_v18, %v1606_v19 }
 0xefd   :  { %v1644_v21 = vpack.c.bf16 %v1607_v20, %v1607_v20 }
 0xeff   :  { %v1649_v22 = vsel %vm235_vm6, %v1644_v21, 0 }
 0xf00   :  { %1658 = vmatpush.bf16.xpose.msrb.mxu0 %v1649_v22 }
 0xf02   :  { %v1608_v25 = vpop.f32.mrf.mxu2 }
 0xf61   :  { %v1492_v26 = vpop.xlane.xlu0 %1491 }
 0xf62   :  { %v1493_v27 = vsub.f32 %v1487_v14, %v1492_v26 }
 0xf64   :  { %v1494_v28 = vmul.f32 1.442695, %v1493_v27 }
 0xf66   :  { %2312 = vpow2.f32 %v1494_v28 }
 0xf6c   :  { %v2313_v29 = vpop.eup %2312 }
 0xf6d   :  { %v1496_v30 = vsel %vm235_vm6, %v2313_v29, 0.0 }
 0xf6e   :  { %1497 = vadd.xlane.f32.xlu1 %v1496_v30 }
 0xfe1   :  { %v1498_v35 = vpop.xlane.xlu1 %1497 }
 0xfe2   :  { %2314 = vrcp.f32 %v1498_v35 }
 0xfe8   :  { %v2315_v36 = vpop.eup %2314 }
 0xfe9   :  { %v1500_v37 = vmul.f32 %v2315_v36, %v2313_v29 }
 0xfeb   :  { %v1501_v41 = vpack.c.bf16 %v1500_v37, %v1500_v37 }
 0xfed   :  { %2134 = vmatmul.msk.bf16.vlgmr.msra.gmra.mxu3 %vm235_vm6, %v1501_v41 }
 0xfee   :  { %1754 = vmatpush.bf16.msra.mxu3 %v2726_v23  ;;  %v1574_v23 = vadd.f32 %v2275_v46, %v1573_v13 }
 0xff0   :  { %v1643_v49 = vpack.c.bf16 %v1574_v23, %v1574_v23 }
 0xff2   :  { %1755 = vmatpush.bf16.msra.mxu3 %v2732_v24 }
 0xffd   :  { %2178 = vmatmul.msk.bf16.vlgmr.msrb.gmra.mxu3 %vm92_vm0, %v2683_v53  ;;  %v2277_v53 = vld [vmem:[%s2996_s8 + $0x3] ss:$0 sm:$0xff] }
0x1070   :  { %v1518_v43 = vpop.f32.mrf.mxu3 }
0x1071   :  { %v1522_v44 = vpack.c.bf16 %v1518_v43, %v1518_v43 }
0x1073   :  { %2136 = vmatmul.msk.bf16.vlgmr.msra.gmra.mxu0 %vm235_vm6, %v1522_v44 }
0x1074   :  { %1771 = vmatpush.bf16.msra.mxu0 %v2761_v47 }
0x1078   :  { %v1520_v45 = vpop.f32.mrf.mxu3  ;;  %1772 = vmatpush.bf16.msra.mxu0 %v2770_v51 }
0x107c   :  { %1773 = vmatpush.bf16.msra.mxu0 %v2785_v60  ;;  %v1367_v60 = vadd.f32 %v2866_v5, %v2917_v61  ;;  %v2181_v5 = vld [vmem:[%s2997_s9 + $0xc] sm:$0xf]  ;;  %s2352_s9 = smov [#allocation2]  }
0x107d   :  { %v1702_v61 = vsel %vm271_vm5, %v2181_v5, 0  ;;  %s1791_s14 = sshll.u32 %s2352_s9, 4  ;;  %s1792_s14 = int_to_ptr.vmem [resolvable:$true] %s1791_s14 }
0x107e   :  { %1711 = vmatpush.bf16.msra.mxu2 %v1702_v61 }
0x1080   :  { %v1639_v24 = vpop.f32.mrf.mxu3  ;;  %1774 = vmatpush.bf16.msra.mxu0 %v2791_v62 }
0x1081   :  { %v1640_v50 = vadd.f32 %v2277_v53, %v1639_v24 }
0x1083   :  { %v1676_v47 = vpack.c.bf16 %v1640_v50, %v1640_v50  ;;  %2179 = vmatmul.msk.bf16.vlgmr.msrb.gmra.mxu0 %vm235_vm6, %v1643_v49 }
0x1084   :  { %1775 = vmatpush.bf16.msra.mxu0 %v2797_v63 }
0x1085   :  { %v1681_v51 = vsel %vm271_vm5, %v1676_v47, 0 }
0x1086   :  { %1690 = vmatpush.bf16.msra.mxu1 %v1681_v51 }
0x1088   :  { %v1641_v52 = vpop.f32.mrf.mxu3  ;;  %1776 = vmatpush.bf16.msra.mxu0 %v2803_v1 }
0x108c   :  { %1777 = vmatpush.bf16.msra.mxu0 %v2809_v2 }
0x1090   :  { %1778 = vmatpush.bf16.msra.mxu0 %v2815_v3 }
0x10f0   :  { %v1539_v62 = vpop.f32.mrf.mxu0 }
0x10f1   :  { %v1543_v54 = vadd.f32 %v1539_v62, %v1367_v60 }
0x10f8   :  { %v1541_v55 = vpop.f32.mrf.mxu0 }
0x1100   :  { %v1660_v56 = vpop.f32.mrf.mxu0 }
0x1101   :  { %v1661_v57 = vadd.f32 %v1660_v56, %v2536_v9 }
0x1103   :  { %v1664_v63 = vsel %vm235_vm6, %v1661_v57, -inf }
0x1104   :  { %1665 = vmax.xlane.f32.xlu2 %v1664_v63 }
0x1108   :  { %v1662_v58 = vpop.f32.mrf.mxu0 }
0x1177   :  { %v1666_v31 = vpop.xlane.xlu2 %1665 }
0x1178   :  { %v1667_v34 = vsub.f32 %v1661_v57, %v1666_v31 }
0x117a   :  { %v1668_v1 = vmul.f32 1.442695, %v1667_v34 }
0x117c   :  { %2316 = vpow2.f32 %v1668_v1 }
0x1182   :  { %v2317_v2 = vpop.eup %2316 }
0x1183   :  { %v1670_v3 = vsel %vm235_vm6, %v2317_v2, 0.0 }
0x1184   :  { %1671 = vadd.xlane.f32.xlu0 %v1670_v3 }
0x11f7   :  { %v1672_v9 = vpop.xlane.xlu0 %1671 }
0x11f8   :  { %2318 = vrcp.f32 %v1672_v9 }
0x11fe   :  { %v2319_v4 = vpop.eup %2318 }
0x11ff   :  { %v1674_v0 = vmul.f32 %v2319_v4, %v2317_v2 }
0x1201   :  { %v1675_v6 = vpack.c.bf16 %v1674_v0, %v1674_v0 }
0x1203   :  { %2180 = vmatmul.msk.bf16.vlgmr.msra.gmra.mxu1 %vm235_vm6, %v1675_v6 }
0x1280   :  { %v1692_v7 = vpop.f32.mrf.mxu1 }
0x1281   :  { %v1696_v10 = vpack.c.bf16 %v1692_v7, %v1692_v7 }
0x1283   :  { %2182 = vmatmul.msk.bf16.vlgmr.msra.gmra.mxu2 %vm235_vm6, %v1696_v10 }
0x1288   :  { %v1694_v11 = vpop.f32.mrf.mxu1 }
0x1306   :  { %v1713_v12 = vpop.f32.mrf.mxu2 }
0x1307   :  { %v1717_v13 = vadd.f32 %v1713_v12, %v1543_v54 }
0x1309   :  { %v1718_v14 = vadd.f32 %v2655_v15, %v1717_v13 }
0x130b   :  { %v1719_v16 = vadd.f32 %v2694_v59, %v1718_v14 }
0x130d   :  { %v1720_v48 = vsel %vm92_vm0, %v1719_v16, 0.0 }
0x130e   :  { %1721 = vadd.xlane.f32.xlu1 %v1720_v48  ;;  %v1715_v17 = vpop.f32.mrf.mxu2 }
0x1381   :  { %v1722_v18 = vpop.xlane.xlu1 %1721 }
0x1382   :  { %v1723_v19 = vmul.f32 %v1722_v18, %v2452_v8 }
0x1384   :  { %v1724_v20 = vsub.f32 %v1719_v16, %v1723_v19 }
0x1386   :  { %v1725_v21 = vmul.f32 %v1724_v20, %v1724_v20 }
0x1388   :  { %v1726_v22 = vsel %vm92_vm0, %v1725_v21, 0.0 }
0x1389   :  { %1727 = vadd.xlane.f32.xlu2 %v1726_v22 }
0x13fc   :  { %v1728_v25 = vpop.xlane.xlu2 %1727 }
0x13fd   :  { %v1729_v26 = vmul.f32 %v1728_v25, %v2452_v8 }
0x13ff   :  { %v1730_v27 = vadd.f32 1e-05, %v1729_v26 }
0x1401   :  { %2320 = vrsqrt.f32 %v1730_v27  ;;  %vm1737_vm15 = vweird.f32 %v1730_v27 }
0x1407   :  { %v2321_v15 = vpop.eup %2320 }
0x1408   :  { %v1732_v28 = vmul.f32 %v2321_v15, %v1730_v27  ;;  %vm1738_vm14 = vweird.f32 %v2321_v15 }
0x1409   :  { %vm1739_vm1 = vmor %vm1737_vm15, %vm1738_vm14 }
0x140a   :  { %v1733_v59 = vmul.f32 %v2321_v15, %v1732_v28 }
0x140c   :  { %v1734_v29 = vmul.f32 0.5, %v1733_v59 }
0x140e   :  { %v1735_v30 = vsub.f32 1.5, %v1734_v29 }
0x1410   :  { %v1736_v32 = vmul.f32 %v2321_v15, %v1735_v30 }
0x1412   :  { %v1740_v33 = vsel %vm1739_vm1, %v2321_v15, %v1736_v32 }
0x1413   :  { %v1741_v35 = vmul.f32 %v1740_v33, %v1724_v20 }
0x1415   :  { %v1742_v36 = vmul.f32 %v2745_v39, %v1741_v35 }
0x1417   :  { %v1743_v37 = vadd.f32 %v2750_v42, %v1742_v36 }
0x1419   :  { %v1744_v41 = vpack.c.bf16 %v1743_v37, %v1743_v37 }
0x141b   :  { %2183 = vmatmul.msk.bf16.vlgmr.msra.gmra.mxu3 %vm92_vm0, %v1744_v41 }
0x149e   :  { %v1757_v8 = vpop.f32.mrf.mxu3 }
0x149f   :  { %v1758_v43 = vadd.f32 %v2821_v38, %v1757_v8 }
0x14a1   :  { %v1762_v44 = vmul.f32 0.044715, %v1758_v43  ;;  %v1761_v50 = vmul.f32 0.5, %v1758_v43 }
0x14a3   :  { %v1763_v45 = vmul.f32 %v1762_v44, %v1758_v43 }
0x14a5   :  { %v1764_v46 = vmul.f32 %v1763_v45, %v1758_v43 }
0x14a6   :  { %v1759_v23 = vpop.f32.mrf.mxu3 }
0x14a7   :  { %v1765_v53 = vadd.f32 %v1764_v46, %v1758_v43 }
0x14a9   :  { %v1766_v24 = vmul.f32 0.7978846, %v1765_v53 }
0x14ab   :  { %2322 = vtanh.f32 %v1766_v24 }
0x14b1   :  { %v2323_v49 = vpop.eup %2322 }
0x14b2   :  { %v1768_v47 = vadd.f32 1.0, %v2323_v49 }
0x14b4   :  { %v1769_v51 = vmul.f32 %v1768_v47, %v1761_v50 }
0x14b6   :  { %v1770_v39 = vpack.c.bf16 %v1769_v51, %v1769_v51 }
0x14b8   :  { %1779 = vmatmul.bf16.vlgmr.msra.gmra.mxu0 %v1770_v39 }
0x1535   :  { %v1780_v42 = vpop.f32.mrf.mxu0 }
0x1536   :  { %v1781_v38 = vadd.f32 %v2844_v40, %v1780_v42 }
0x1538   :  { %v1784_v52 = vadd.f32 %v1781_v38, %v1719_v16 }
0x153a   :  { %1786 = vst.msk [vmem:[#allocation2 + $0x8] sm:$0xff] %vm92_vm0, %v1784_v52 }
0x153b   :  { %1799 = dma.vmem_to_hbm [thread:$0]  %s1792_s14, 256, %s1794_s25, [#allocation3], %s2353_s27, %s2353_s27, %s2354_s28  }
0x153d   :  { %v1782_v60 = vpop.f32.mrf.mxu0 }
0x153e   :  { %2348 = dma.done.wait [#allocation3], 256  }
0x153f   :  { %2349 = vsyncadd [#allocation3], 4294967040 }
0x1540   :  { %1804 = vsyncpa [#allocation3], 1 }

</bundles_post_ra>
